<compile_context>
chip_gen: v7x
topology: tpu7x:2x2x1
jax: 0.10.0
libtpu: 0.0.40
codegen_flags: <defaults>
</compile_context>

<pallas_src>
import functools

import jax
import jax.numpy as jnp
from jax.experimental import pallas as pl
from jax.experimental.pallas import tpu as pltpu


def attention_kernel(x_ref, gamma_ref, beta_ref, wqkv_ref, wo_ref, bo_ref,
                     out_ref, o_scratch, *, heads, dim_head, eps):
    inner = heads * dim_head
    scale = dim_head ** (-0.5)
    bt, n, dim = x_ref.shape
    rows = bt * n

    # ---- LayerNorm over all Bt*N rows at once (f32 VPU math) ----
    x = x_ref[...].reshape(rows, dim)              # merge leading dims: cheap
    gamma = gamma_ref[...]                         # (1, dim)
    beta = beta_ref[...]                           # (1, dim)
    mean = jnp.mean(x, axis=-1, keepdims=True)
    var = jnp.mean((x - mean) ** 2, axis=-1, keepdims=True)
    xn = (x - mean) * jax.lax.rsqrt(var + eps) * gamma + beta

    # ---- one fused qkv projection: bf16 operands, f32 accumulation ----
    qkv = jnp.dot(xn.astype(jnp.bfloat16), wqkv_ref[...],
                  preferred_element_type=jnp.float32)          # (rows, 3*inner)

    # fold the softmax scale into q once (touches rows*inner, not heads*N*N)
    q = (qkv[:, :inner] * scale).astype(jnp.bfloat16)
    k = qkv[:, inner:2 * inner].astype(jnp.bfloat16)
    v = qkv[:, 2 * inner:].astype(jnp.bfloat16)

    # ---- per-head attention, batched over the Bt batch elements ----
    for h in range(heads):                          # heads is small -> unroll
        lo = h * dim_head
        hi = lo + dim_head
        qh = q[:, lo:hi].reshape(bt, n, dim_head)
        kh = k[:, lo:hi].reshape(bt, n, dim_head)
        vh = v[:, lo:hi].reshape(bt, n, dim_head)

        # contraction on the last dim of both q and k -> no explicit transpose
        dots = jnp.einsum('bnd,bmd->bnm', qh, kh,
                          preferred_element_type=jnp.float32)   # (bt, n, n)
        dots = dots - jnp.max(dots, axis=-1, keepdims=True)
        e = jnp.exp(dots)                                       # f32 EUP
        attn = e * pl.reciprocal(jnp.sum(e, axis=-1, keepdims=True),
                                 approx=True)

        oh = jnp.einsum('bnm,bmd->bnd', attn.astype(jnp.bfloat16), vh,
                        preferred_element_type=jnp.float32)     # (bt, n, d)

        # write this head's output into its static column slice (no concat)
        o_scratch[:, lo:hi] = oh.reshape(rows, dim_head)

    # ---- single output projection from the scratch ----
    out = jnp.dot(o_scratch[...].astype(jnp.bfloat16), wo_ref[...],
                  preferred_element_type=jnp.float32) + bo_ref[...]
    out_ref[...] = out.reshape(bt, n, dim).astype(out_ref.dtype)


def _pick_batch_block(B):
    """Largest divisor of B that still leaves >= 2 grid steps (v7x: 2 TCs)."""
    if B < 2:
        return B
    best = 1
    for bt in range(1, B + 1):
        if B % bt == 0 and B // bt >= 2:
            best = bt
    return best


def attention_forward(x, params, *, heads, dim_head, eps=1e-5, batch_block=None):
    B, N, dim = x.shape
    inner = heads * dim_head
    gamma, beta, wqkv, wo, bo = params

    if batch_block is None:
        batch_block = _pick_batch_block(B)
    assert B % batch_block == 0
    grid_b = B // batch_block

    # halve weight DMA traffic; accumulation stays f32 inside the kernel
    wqkv_bf = wqkv.astype(jnp.bfloat16)
    wo_bf = wo.astype(jnp.bfloat16)

    kernel = functools.partial(attention_kernel,
                               heads=heads, dim_head=dim_head, eps=eps)

    cost = pl.CostEstimate(
        flops=int(2 * B * N * dim * 3 * inner          # qkv projection
                  + 2 * B * heads * N * N * dim_head   # q @ k^T
                  + 2 * B * heads * N * N * dim_head   # attn @ v
                  + 2 * B * N * inner * dim            # output projection
                  + 10 * B * N * dim),                 # layernorm
        transcendentals=int(B * heads * N * N + B * N),
        bytes_accessed=int(4 * B * N * dim * 2                      # x, out
                           + 2 * (dim * 3 * inner + inner * dim)    # bf16 weights
                           + 4 * 3 * dim),                          # gamma/beta/bo
    )

    return pl.pallas_call(
        kernel,
        out_shape=jax.ShapeDtypeStruct((B, N, dim), x.dtype),
        grid_spec=pltpu.PrefetchScalarGridSpec(
            num_scalar_prefetch=0,
            grid=(grid_b,),
            in_specs=[
                pl.BlockSpec((batch_block, N, dim), lambda b: (b, 0, 0)),  # x
                pl.BlockSpec((1, dim), lambda b: (0, 0)),                  # gamma
                pl.BlockSpec((1, dim), lambda b: (0, 0)),                  # beta
                pl.BlockSpec((dim, 3 * inner), lambda b: (0, 0)),          # wqkv
                pl.BlockSpec((inner, dim), lambda b: (0, 0)),              # wo
                pl.BlockSpec((1, dim), lambda b: (0, 0)),                  # bo
            ],
            out_specs=pl.BlockSpec((batch_block, N, dim), lambda b: (b, 0, 0)),
            scratch_shapes=[pltpu.VMEM((batch_block * N, inner), jnp.float32)],
        ),
        compiler_params=pltpu.CompilerParams(
            dimension_semantics=("parallel",)),
        cost_estimate=cost,
    )(x, gamma, beta, wqkv_bf, wo_bf, bo)


def reference_attention(x, params, *, heads, dim_head, eps=1e-5):
    """Pure-JAX f32 reference mirroring the PyTorch module."""
    gamma, beta, wqkv, wo, bo = params
    inner = heads * dim_head

    m = jnp.mean(x, axis=-1, keepdims=True)
    v_ = jnp.mean((x - m) ** 2, axis=-1, keepdims=True)
    xn = (x - m) / jnp.sqrt(v_ + eps) * gamma[0] + beta[0]

    qkv = xn @ wqkv
    q, k, v = qkv[..., :inner], qkv[..., inner:2 * inner], qkv[..., 2 * inner:]

    def split_heads(t):
        B, S, _ = t.shape
        return t.reshape(B, S, heads, dim_head).transpose(0, 2, 1, 3)

    qh, kh, vh = split_heads(q), split_heads(k), split_heads(v)
    dots = jnp.einsum('bhnd,bhmd->bhnm', qh, kh) * (dim_head ** -0.5)
    attn = jax.nn.softmax(dots, axis=-1)
    o = jnp.einsum('bhnm,bhmd->bhnd', attn, vh)
    o = o.transpose(0, 2, 1, 3).reshape(x.shape[0], x.shape[1], inner)
    return o @ wo + bo[0]


if __name__ == "__main__":
    # small shapes consistent with the module (project_out=True here since
    # heads != 1 / dim_head != dim); dropout p=0.0 -> identity.
    B, N = 8, 16          # batch, sequence
    dim = 32
    heads = 4
    dim_head = 16
    inner = heads * dim_head   # 64

    key = jax.random.PRNGKey(0)
    ks = jax.random.split(key, 6)
    x = jax.random.normal(ks[0], (B, N, dim), dtype=jnp.float32)

    # deterministic synthetic parameters (shapes implied by the module __init__)
    gamma = jnp.ones((1, dim), jnp.float32)                                # LayerNorm weight
    beta = jnp.zeros((1, dim), jnp.float32)                                # LayerNorm bias
    wqkv = jax.random.normal(ks[1], (dim, 3 * inner), jnp.float32) * 0.05  # to_qkv (pre-transposed)
    wo = jax.random.normal(ks[2], (inner, dim), jnp.float32) * 0.05        # to_out[0] weight (pre-transposed)
    bo = jax.random.normal(ks[3], (1, dim), jnp.float32) * 0.05            # to_out[0] bias
    params = (gamma, beta, wqkv, wo, bo)

    out = attention_forward(x, params, heads=heads, dim_head=dim_head)
    out = jax.block_until_ready(out)

    ref = reference_attention(x, params, heads=heads, dim_head=dim_head)
    assert out.shape == (B, N, dim)
    # bf16 matmul operands (f32 accumulation) -> small deviation vs f32 reference
    assert jnp.allclose(out, ref, atol=3e-2, rtol=3e-2), \
        "Pallas kernel mismatch vs reference"

    print("KERNEL_OK")
</pallas_src>

<mosaic_0001>
module attributes {stable_mosaic.version = 11 : i64} {
  func.func @attention_kernel(%arg0: i32, %arg1: memref<4x16x32xf32, #tpu.memory_space<vmem>>, %arg2: memref<1x32xf32, #tpu.memory_space<vmem>>, %arg3: memref<1x32xf32, #tpu.memory_space<vmem>>, %arg4: memref<32x192xbf16, #tpu.memory_space<vmem>>, %arg5: memref<64x32xbf16, #tpu.memory_space<vmem>>, %arg6: memref<1x32xf32, #tpu.memory_space<vmem>>, %arg7: memref<4x16x32xf32, #tpu.memory_space<vmem>>, %arg8: memref<64x64xf32, #tpu.memory_space<vmem>>) attributes {dimension_semantics = [#tpu.dimension_semantics<parallel>], iteration_bounds = array<i64: 2>, scalar_prefetch = 0 : i64, scratch_operands = 1 : i64, tpu.core_type = #tpu.core_type<tc>, window_params = [{transform_indices = @transform_0, window_bounds = array<i64: 4, 16, 32>}, {pipeline_mode = #tpu.pipeline_mode<synchronous>, transform_indices = @transform_1, window_bounds = array<i64: 1, 32>}, {pipeline_mode = #tpu.pipeline_mode<synchronous>, transform_indices = @transform_2, window_bounds = array<i64: 1, 32>}, {pipeline_mode = #tpu.pipeline_mode<synchronous>, transform_indices = @transform_3, window_bounds = array<i64: 32, 192>}, {pipeline_mode = #tpu.pipeline_mode<synchronous>, transform_indices = @transform_4, window_bounds = array<i64: 64, 32>}, {pipeline_mode = #tpu.pipeline_mode<synchronous>, transform_indices = @transform_5, window_bounds = array<i64: 1, 32>}, {transform_indices = @transform_6, window_bounds = array<i64: 4, 16, 32>}]} {
    %c0 = arith.constant 0 : index
    %c0_0 = arith.constant 0 : index
    %c0_1 = arith.constant 0 : index
    %0 = vector.load %arg1[%c0, %c0_0, %c0_1] : memref<4x16x32xf32, #tpu.memory_space<vmem>>, vector<4x16x32xf32>
    %1 = vector.shape_cast %0 : vector<4x16x32xf32> to vector<64x32xf32>
    %c0_2 = arith.constant 0 : index
    %c0_3 = arith.constant 0 : index
    %2 = vector.load %arg2[%c0_2, %c0_3] : memref<1x32xf32, #tpu.memory_space<vmem>>, vector<1x32xf32>
    %c0_4 = arith.constant 0 : index
    %c0_5 = arith.constant 0 : index
    %3 = vector.load %arg3[%c0_4, %c0_5] : memref<1x32xf32, #tpu.memory_space<vmem>>, vector<1x32xf32>
    %cst = arith.constant dense<0.000000e+00> : vector<64xf32>
    %4 = vector.multi_reduction <add>, %1, %cst [1] : vector<64x32xf32> to vector<64xf32>
    %5 = vector.shape_cast %4 : vector<64xf32> to vector<64x1xf32>
    %cst_6 = arith.constant 3.200000e+01 : f32
    %6 = vector.broadcast %cst_6 : f32 to vector<64x1xf32>
    %7 = arith.divf %5, %6 : vector<64x1xf32>
    %8 = vector.broadcast %7 : vector<64x1xf32> to vector<64x32xf32>
    %9 = arith.subf %1, %8 : vector<64x32xf32>
    %10 = arith.mulf %9, %9 : vector<64x32xf32>
    %cst_7 = arith.constant dense<0.000000e+00> : vector<64xf32>
    %11 = vector.multi_reduction <add>, %10, %cst_7 [1] : vector<64x32xf32> to vector<64xf32>
    %12 = vector.shape_cast %11 : vector<64xf32> to vector<64x1xf32>
    %cst_8 = arith.constant 3.200000e+01 : f32
    %13 = vector.broadcast %cst_8 : f32 to vector<64x1xf32>
    %14 = arith.divf %12, %13 : vector<64x1xf32>
    %15 = vector.broadcast %7 : vector<64x1xf32> to vector<64x32xf32>
    %16 = arith.subf %1, %15 : vector<64x32xf32>
    %cst_9 = arith.constant 9.99999974E-6 : f32
    %17 = vector.broadcast %cst_9 : f32 to vector<64x1xf32>
    %18 = arith.addf %14, %17 : vector<64x1xf32>
    %19 = math.rsqrt %18 : vector<64x1xf32>
    %20 = vector.broadcast %19 : vector<64x1xf32> to vector<64x32xf32>
    %21 = arith.mulf %16, %20 : vector<64x32xf32>
    %22 = vector.broadcast %2 : vector<1x32xf32> to vector<64x32xf32>
    %23 = arith.mulf %21, %22 : vector<64x32xf32>
    %24 = vector.broadcast %3 : vector<1x32xf32> to vector<64x32xf32>
    %25 = arith.addf %23, %24 : vector<64x32xf32>
    %26 = arith.truncf %25 : vector<64x32xf32> to vector<64x32xbf16>
    %c0_10 = arith.constant 0 : index
    %c0_11 = arith.constant 0 : index
    %27 = vector.load %arg4[%c0_10, %c0_11] : memref<32x192xbf16, #tpu.memory_space<vmem>>, vector<32x192xbf16>
    %cst_12 = arith.constant dense<0.000000e+00> : vector<64x192xf32>
    %28 = tpu.matmul %26, %27, %cst_12 {dimension_numbers = #tpu.dot_dimension_numbers<[1], [0], [0], [1], [0, 0, 1, 1], [], []>} : vector<64x32xbf16>, vector<32x192xbf16>, vector<64x192xf32> -> vector<64x192xf32>
    %29 = vector.extract_strided_slice %28 {offsets = [0, 0], sizes = [64, 64], strides = [1, 1]} : vector<64x192xf32> to vector<64x64xf32>
    %cst_13 = arith.constant 2.500000e-01 : f32
    %30 = vector.broadcast %cst_13 : f32 to vector<64x64xf32>
    %31 = arith.mulf %29, %30 : vector<64x64xf32>
    %32 = arith.truncf %31 : vector<64x64xf32> to vector<64x64xbf16>
    %33 = vector.extract_strided_slice %28 {offsets = [0, 64], sizes = [64, 64], strides = [1, 1]} : vector<64x192xf32> to vector<64x64xf32>
    %34 = arith.truncf %33 : vector<64x64xf32> to vector<64x64xbf16>
    %35 = vector.extract_strided_slice %28 {offsets = [0, 128], sizes = [64, 64], strides = [1, 1]} : vector<64x192xf32> to vector<64x64xf32>
    %36 = arith.truncf %35 : vector<64x64xf32> to vector<64x64xbf16>
    %37 = vector.extract_strided_slice %32 {offsets = [0, 0], sizes = [64, 16], strides = [1, 1]} : vector<64x64xbf16> to vector<64x16xbf16>
    %38 = vector.shape_cast %37 : vector<64x16xbf16> to vector<4x16x16xbf16>
    %39 = vector.extract_strided_slice %34 {offsets = [0, 0], sizes = [64, 16], strides = [1, 1]} : vector<64x64xbf16> to vector<64x16xbf16>
    %40 = vector.shape_cast %39 : vector<64x16xbf16> to vector<4x16x16xbf16>
    %41 = vector.extract_strided_slice %36 {offsets = [0, 0], sizes = [64, 16], strides = [1, 1]} : vector<64x64xbf16> to vector<64x16xbf16>
    %42 = vector.shape_cast %41 : vector<64x16xbf16> to vector<4x16x16xbf16>
    "tpu.trace_start"() <{level = 10 : i32, message = "bnd,bmd->bnm"}> : () -> ()
    %cst_14 = arith.constant dense<0.000000e+00> : vector<4x16x16xf32>
    %43 = tpu.matmul %38, %40, %cst_14 {dimension_numbers = #tpu.dot_dimension_numbers<[2], [2], [1], [1], [0, 0, 0, 1, 1, 1], [0], [0]>} : vector<4x16x16xbf16>, vector<4x16x16xbf16>, vector<4x16x16xf32> -> vector<4x16x16xf32>
    "tpu.trace_stop"() : () -> ()
    %cst_15 = arith.constant dense<0xFF800000> : vector<4x16xf32>
    %44 = vector.multi_reduction <maximumf>, %43, %cst_15 [2] : vector<4x16x16xf32> to vector<4x16xf32>
    %45 = vector.shape_cast %44 : vector<4x16xf32> to vector<4x16x1xf32>
    %46 = vector.broadcast %45 : vector<4x16x1xf32> to vector<4x16x16xf32>
    %47 = arith.subf %43, %46 : vector<4x16x16xf32>
    %48 = math.exp %47 : vector<4x16x16xf32>
    %cst_16 = arith.constant dense<0.000000e+00> : vector<4x16xf32>
    %49 = vector.multi_reduction <add>, %48, %cst_16 [2] : vector<4x16x16xf32> to vector<4x16xf32>
    %50 = vector.shape_cast %49 : vector<4x16xf32> to vector<4x16x1xf32>
    %51 = tpu.reciprocal %50 {approx = true} : vector<4x16x1xf32> -> vector<4x16x1xf32>
    %52 = vector.broadcast %51 : vector<4x16x1xf32> to vector<4x16x16xf32>
    %53 = arith.mulf %48, %52 : vector<4x16x16xf32>
    %54 = arith.truncf %53 : vector<4x16x16xf32> to vector<4x16x16xbf16>
    "tpu.trace_start"() <{level = 10 : i32, message = "bnm,bmd->bnd"}> : () -> ()
    %cst_17 = arith.constant dense<0.000000e+00> : vector<4x16x16xf32>
    %55 = tpu.matmul %54, %42, %cst_17 {dimension_numbers = #tpu.dot_dimension_numbers<[2], [1], [1], [2], [0, 0, 0, 1, 1, 2], [0], [0]>} : vector<4x16x16xbf16>, vector<4x16x16xbf16>, vector<4x16x16xf32> -> vector<4x16x16xf32>
    "tpu.trace_stop"() : () -> ()
    %56 = vector.shape_cast %55 : vector<4x16x16xf32> to vector<64x16xf32>
    %c0_18 = arith.constant 0 : index
    %c0_19 = arith.constant 0 : index
    %57 = vector.load %arg8[%c0_18, %c0_19] : memref<64x64xf32, #tpu.memory_space<vmem>>, vector<64x16xf32>
    tpu.vector_store %arg8[%c0_18, %c0_19], %56 {strides = array<i32>} : memref<64x64xf32, #tpu.memory_space<vmem>>, vector<64x16xf32>,
    %58 = vector.extract_strided_slice %32 {offsets = [0, 16], sizes = [64, 16], strides = [1, 1]} : vector<64x64xbf16> to vector<64x16xbf16>
    %59 = vector.shape_cast %58 : vector<64x16xbf16> to vector<4x16x16xbf16>
    %60 = vector.extract_strided_slice %34 {offsets = [0, 16], sizes = [64, 16], strides = [1, 1]} : vector<64x64xbf16> to vector<64x16xbf16>
    %61 = vector.shape_cast %60 : vector<64x16xbf16> to vector<4x16x16xbf16>
    %62 = vector.extract_strided_slice %36 {offsets = [0, 16], sizes = [64, 16], strides = [1, 1]} : vector<64x64xbf16> to vector<64x16xbf16>
    %63 = vector.shape_cast %62 : vector<64x16xbf16> to vector<4x16x16xbf16>
    "tpu.trace_start"() <{level = 10 : i32, message = "bnd,bmd->bnm"}> : () -> ()
    %cst_20 = arith.constant dense<0.000000e+00> : vector<4x16x16xf32>
    %64 = tpu.matmul %59, %61, %cst_20 {dimension_numbers = #tpu.dot_dimension_numbers<[2], [2], [1], [1], [0, 0, 0, 1, 1, 1], [0], [0]>} : vector<4x16x16xbf16>, vector<4x16x16xbf16>, vector<4x16x16xf32> -> vector<4x16x16xf32>
    "tpu.trace_stop"() : () -> ()
    %cst_21 = arith.constant dense<0xFF800000> : vector<4x16xf32>
    %65 = vector.multi_reduction <maximumf>, %64, %cst_21 [2] : vector<4x16x16xf32> to vector<4x16xf32>
    %66 = vector.shape_cast %65 : vector<4x16xf32> to vector<4x16x1xf32>
    %67 = vector.broadcast %66 : vector<4x16x1xf32> to vector<4x16x16xf32>
    %68 = arith.subf %64, %67 : vector<4x16x16xf32>
    %69 = math.exp %68 : vector<4x16x16xf32>
    %cst_22 = arith.constant dense<0.000000e+00> : vector<4x16xf32>
    %70 = vector.multi_reduction <add>, %69, %cst_22 [2] : vector<4x16x16xf32> to vector<4x16xf32>
    %71 = vector.shape_cast %70 : vector<4x16xf32> to vector<4x16x1xf32>
    %72 = tpu.reciprocal %71 {approx = true} : vector<4x16x1xf32> -> vector<4x16x1xf32>
    %73 = vector.broadcast %72 : vector<4x16x1xf32> to vector<4x16x16xf32>
    %74 = arith.mulf %69, %73 : vector<4x16x16xf32>
    %75 = arith.truncf %74 : vector<4x16x16xf32> to vector<4x16x16xbf16>
    "tpu.trace_start"() <{level = 10 : i32, message = "bnm,bmd->bnd"}> : () -> ()
    %cst_23 = arith.constant dense<0.000000e+00> : vector<4x16x16xf32>
    %76 = tpu.matmul %75, %63, %cst_23 {dimension_numbers = #tpu.dot_dimension_numbers<[2], [1], [1], [2], [0, 0, 0, 1, 1, 2], [0], [0]>} : vector<4x16x16xbf16>, vector<4x16x16xbf16>, vector<4x16x16xf32> -> vector<4x16x16xf32>
    "tpu.trace_stop"() : () -> ()
    %77 = vector.shape_cast %76 : vector<4x16x16xf32> to vector<64x16xf32>
    %c0_24 = arith.constant 0 : index
    %c16 = arith.constant 16 : index
    %78 = vector.load %arg8[%c0_24, %c16] : memref<64x64xf32, #tpu.memory_space<vmem>>, vector<64x16xf32>
    tpu.vector_store %arg8[%c0_24, %c16], %77 {strides = array<i32>} : memref<64x64xf32, #tpu.memory_space<vmem>>, vector<64x16xf32>,
    %79 = vector.extract_strided_slice %32 {offsets = [0, 32], sizes = [64, 16], strides = [1, 1]} : vector<64x64xbf16> to vector<64x16xbf16>
    %80 = vector.shape_cast %79 : vector<64x16xbf16> to vector<4x16x16xbf16>
    %81 = vector.extract_strided_slice %34 {offsets = [0, 32], sizes = [64, 16], strides = [1, 1]} : vector<64x64xbf16> to vector<64x16xbf16>
    %82 = vector.shape_cast %81 : vector<64x16xbf16> to vector<4x16x16xbf16>
    %83 = vector.extract_strided_slice %36 {offsets = [0, 32], sizes = [64, 16], strides = [1, 1]} : vector<64x64xbf16> to vector<64x16xbf16>
    %84 = vector.shape_cast %83 : vector<64x16xbf16> to vector<4x16x16xbf16>
    "tpu.trace_start"() <{level = 10 : i32, message = "bnd,bmd->bnm"}> : () -> ()
    %cst_25 = arith.constant dense<0.000000e+00> : vector<4x16x16xf32>
    %85 = tpu.matmul %80, %82, %cst_25 {dimension_numbers = #tpu.dot_dimension_numbers<[2], [2], [1], [1], [0, 0, 0, 1, 1, 1], [0], [0]>} : vector<4x16x16xbf16>, vector<4x16x16xbf16>, vector<4x16x16xf32> -> vector<4x16x16xf32>
    "tpu.trace_stop"() : () -> ()
    %cst_26 = arith.constant dense<0xFF800000> : vector<4x16xf32>
    %86 = vector.multi_reduction <maximumf>, %85, %cst_26 [2] : vector<4x16x16xf32> to vector<4x16xf32>
    %87 = vector.shape_cast %86 : vector<4x16xf32> to vector<4x16x1xf32>
    %88 = vector.broadcast %87 : vector<4x16x1xf32> to vector<4x16x16xf32>
    %89 = arith.subf %85, %88 : vector<4x16x16xf32>
    %90 = math.exp %89 : vector<4x16x16xf32>
    %cst_27 = arith.constant dense<0.000000e+00> : vector<4x16xf32>
    %91 = vector.multi_reduction <add>, %90, %cst_27 [2] : vector<4x16x16xf32> to vector<4x16xf32>
    %92 = vector.shape_cast %91 : vector<4x16xf32> to vector<4x16x1xf32>
    %93 = tpu.reciprocal %92 {approx = true} : vector<4x16x1xf32> -> vector<4x16x1xf32>
    %94 = vector.broadcast %93 : vector<4x16x1xf32> to vector<4x16x16xf32>
    %95 = arith.mulf %90, %94 : vector<4x16x16xf32>
    %96 = arith.truncf %95 : vector<4x16x16xf32> to vector<4x16x16xbf16>
    "tpu.trace_start"() <{level = 10 : i32, message = "bnm,bmd->bnd"}> : () -> ()
    %cst_28 = arith.constant dense<0.000000e+00> : vector<4x16x16xf32>
    %97 = tpu.matmul %96, %84, %cst_28 {dimension_numbers = #tpu.dot_dimension_numbers<[2], [1], [1], [2], [0, 0, 0, 1, 1, 2], [0], [0]>} : vector<4x16x16xbf16>, vector<4x16x16xbf16>, vector<4x16x16xf32> -> vector<4x16x16xf32>
    "tpu.trace_stop"() : () -> ()
    %98 = vector.shape_cast %97 : vector<4x16x16xf32> to vector<64x16xf32>
    %c0_29 = arith.constant 0 : index
    %c32 = arith.constant 32 : index
    %99 = vector.load %arg8[%c0_29, %c32] : memref<64x64xf32, #tpu.memory_space<vmem>>, vector<64x16xf32>
    tpu.vector_store %arg8[%c0_29, %c32], %98 {strides = array<i32>} : memref<64x64xf32, #tpu.memory_space<vmem>>, vector<64x16xf32>,
    %100 = vector.extract_strided_slice %32 {offsets = [0, 48], sizes = [64, 16], strides = [1, 1]} : vector<64x64xbf16> to vector<64x16xbf16>
    %101 = vector.shape_cast %100 : vector<64x16xbf16> to vector<4x16x16xbf16>
    %102 = vector.extract_strided_slice %34 {offsets = [0, 48], sizes = [64, 16], strides = [1, 1]} : vector<64x64xbf16> to vector<64x16xbf16>
    %103 = vector.shape_cast %102 : vector<64x16xbf16> to vector<4x16x16xbf16>
    %104 = vector.extract_strided_slice %36 {offsets = [0, 48], sizes = [64, 16], strides = [1, 1]} : vector<64x64xbf16> to vector<64x16xbf16>
    %105 = vector.shape_cast %104 : vector<64x16xbf16> to vector<4x16x16xbf16>
    "tpu.trace_start"() <{level = 10 : i32, message = "bnd,bmd->bnm"}> : () -> ()
    %cst_30 = arith.constant dense<0.000000e+00> : vector<4x16x16xf32>
    %106 = tpu.matmul %101, %103, %cst_30 {dimension_numbers = #tpu.dot_dimension_numbers<[2], [2], [1], [1], [0, 0, 0, 1, 1, 1], [0], [0]>} : vector<4x16x16xbf16>, vector<4x16x16xbf16>, vector<4x16x16xf32> -> vector<4x16x16xf32>
    "tpu.trace_stop"() : () -> ()
    %cst_31 = arith.constant dense<0xFF800000> : vector<4x16xf32>
    %107 = vector.multi_reduction <maximumf>, %106, %cst_31 [2] : vector<4x16x16xf32> to vector<4x16xf32>
    %108 = vector.shape_cast %107 : vector<4x16xf32> to vector<4x16x1xf32>
    %109 = vector.broadcast %108 : vector<4x16x1xf32> to vector<4x16x16xf32>
    %110 = arith.subf %106, %109 : vector<4x16x16xf32>
    %111 = math.exp %110 : vector<4x16x16xf32>
    %cst_32 = arith.constant dense<0.000000e+00> : vector<4x16xf32>
    %112 = vector.multi_reduction <add>, %111, %cst_32 [2] : vector<4x16x16xf32> to vector<4x16xf32>
    %113 = vector.shape_cast %112 : vector<4x16xf32> to vector<4x16x1xf32>
    %114 = tpu.reciprocal %113 {approx = true} : vector<4x16x1xf32> -> vector<4x16x1xf32>
    %115 = vector.broadcast %114 : vector<4x16x1xf32> to vector<4x16x16xf32>
    %116 = arith.mulf %111, %115 : vector<4x16x16xf32>
    %117 = arith.truncf %116 : vector<4x16x16xf32> to vector<4x16x16xbf16>
    "tpu.trace_start"() <{level = 10 : i32, message = "bnm,bmd->bnd"}> : () -> ()
    %cst_33 = arith.constant dense<0.000000e+00> : vector<4x16x16xf32>
    %118 = tpu.matmul %117, %105, %cst_33 {dimension_numbers = #tpu.dot_dimension_numbers<[2], [1], [1], [2], [0, 0, 0, 1, 1, 2], [0], [0]>} : vector<4x16x16xbf16>, vector<4x16x16xbf16>, vector<4x16x16xf32> -> vector<4x16x16xf32>
    "tpu.trace_stop"() : () -> ()
    %119 = vector.shape_cast %118 : vector<4x16x16xf32> to vector<64x16xf32>
    %c0_34 = arith.constant 0 : index
    %c48 = arith.constant 48 : index
    %120 = vector.load %arg8[%c0_34, %c48] : memref<64x64xf32, #tpu.memory_space<vmem>>, vector<64x16xf32>
    tpu.vector_store %arg8[%c0_34, %c48], %119 {strides = array<i32>} : memref<64x64xf32, #tpu.memory_space<vmem>>, vector<64x16xf32>,
    %c0_35 = arith.constant 0 : index
    %c0_36 = arith.constant 0 : index
    %121 = vector.load %arg8[%c0_35, %c0_36] : memref<64x64xf32, #tpu.memory_space<vmem>>, vector<64x64xf32>
    %122 = arith.truncf %121 : vector<64x64xf32> to vector<64x64xbf16>
    %c0_37 = arith.constant 0 : index
    %c0_38 = arith.constant 0 : index
    %123 = vector.load %arg5[%c0_37, %c0_38] : memref<64x32xbf16, #tpu.memory_space<vmem>>, vector<64x32xbf16>
    %cst_39 = arith.constant dense<0.000000e+00> : vector<64x32xf32>
    %124 = tpu.matmul %122, %123, %cst_39 {dimension_numbers = #tpu.dot_dimension_numbers<[1], [0], [0], [1], [0, 0, 1, 1], [], []>} : vector<64x64xbf16>, vector<64x32xbf16>, vector<64x32xf32> -> vector<64x32xf32>
    %c0_40 = arith.constant 0 : index
    %c0_41 = arith.constant 0 : index
    %125 = vector.load %arg6[%c0_40, %c0_41] : memref<1x32xf32, #tpu.memory_space<vmem>>, vector<1x32xf32>
    %126 = vector.broadcast %125 : vector<1x32xf32> to vector<64x32xf32>
    %127 = arith.addf %124, %126 : vector<64x32xf32>
    %128 = vector.shape_cast %127 : vector<64x32xf32> to vector<4x16x32xf32>
    %c0_42 = arith.constant 0 : index
    %c0_43 = arith.constant 0 : index
    %c0_44 = arith.constant 0 : index
    %129 = vector.load %arg7[%c0_42, %c0_43, %c0_44] : memref<4x16x32xf32, #tpu.memory_space<vmem>>, vector<4x16x32xf32>
    tpu.vector_store %arg7[%c0_42, %c0_43, %c0_44], %128 {strides = array<i32>} : memref<4x16x32xf32, #tpu.memory_space<vmem>>, vector<4x16x32xf32>,
    return
  }
  func.func @transform_0(%arg0: i32) -> (i32, i32, i32) {
    %c0_i32 = arith.constant 0 : i32
    %c0_i32_0 = arith.constant 0 : i32
    %c0_i32_1 = arith.constant 0 : i32
    return %arg0, %c0_i32, %c0_i32_0 : i32, i32, i32
  }
  func.func @transform_1(%arg0: i32) -> (i32, i32) {
    %c0_i32 = arith.constant 0 : i32
    %c0_i32_0 = arith.constant 0 : i32
    %c0_i32_1 = arith.constant 0 : i32
    return %c0_i32, %c0_i32_0 : i32, i32
  }
  func.func @transform_2(%arg0: i32) -> (i32, i32) {
    %c0_i32 = arith.constant 0 : i32
    %c0_i32_0 = arith.constant 0 : i32
    %c0_i32_1 = arith.constant 0 : i32
    return %c0_i32, %c0_i32_0 : i32, i32
  }
  func.func @transform_3(%arg0: i32) -> (i32, i32) {
    %c0_i32 = arith.constant 0 : i32
    %c0_i32_0 = arith.constant 0 : i32
    %c0_i32_1 = arith.constant 0 : i32
    return %c0_i32, %c0_i32_0 : i32, i32
  }
  func.func @transform_4(%arg0: i32) -> (i32, i32) {
    %c0_i32 = arith.constant 0 : i32
    %c0_i32_0 = arith.constant 0 : i32
    %c0_i32_1 = arith.constant 0 : i32
    return %c0_i32, %c0_i32_0 : i32, i32
  }
  func.func @transform_5(%arg0: i32) -> (i32, i32) {
    %c0_i32 = arith.constant 0 : i32
    %c0_i32_0 = arith.constant 0 : i32
    %c0_i32_1 = arith.constant 0 : i32
    return %c0_i32, %c0_i32_0 : i32, i32
  }
  func.func @transform_6(%arg0: i32) -> (i32, i32, i32) {
    %c0_i32 = arith.constant 0 : i32
    %c0_i32_0 = arith.constant 0 : i32
    %c0_i32_1 = arith.constant 0 : i32
    return %arg0, %c0_i32, %c0_i32_0 : i32, i32, i32
  }
}

</mosaic_0001>

<bundles_post_ra>
// kernel: tpu_custom_call.1
= control target key start
LH: loop header
LB: loop body
LE: loop exit
PB: predicated region body
PF: predicated region fallthrough
CT: control target
= control target key end

     0   :  { %11 = vsyncpa [#allocation4], 0  ;;  %s4341_s0 = inlined_call_operand.hbm [shape: f32[8,16,32], index: 0, kind: input, shape index: {}]   ;;  %s4342_s1 = inlined_call_operand.vmem [shape: f32[1,32], index: 1, kind: input, shape index: {}]   ;;  %s4343_s2 = inlined_call_operand.vmem [shape: f32[1,32], index: 2, kind: input, shape index: {}]   ;;  %s4344_s3 = inlined_call_operand.vmem [shape: bf16[32,192], index: 3, kind: input, shape index: {}]   ;;  %s4345_s4 = inlined_call_operand.vmem [shape: bf16[64,32], index: 4, kind: input, shape index: {}]   ;;  %s4346_s5 = inlined_call_operand.vmem [shape: f32[1,32], index: 5, kind: input, shape index: {}]   ;;  %s4347_s6 = inlined_call_operand.hbm [shape: f32[8,16,32], index: 6, kind: output, shape index: {}]  }
   0x1   :  { %13 = vsyncpa [#allocation4 + $0x1], 0 }
   0x2   :  { %14 = vsyncpa [#allocation5], 0 }
   0x3   :  { %16 = vsyncpa [#allocation5 + $0x1], 0  ;;  %s3554_s21 = smov 0   ;;  %s3556_s22 = smov 0  }
   0x4   :  { %s3558_s23 = smov 0   ;;  %s3560_s24 = smov 0  }
   0x5 LB: > { %s3575_s25 = sadd.s32 4294967295, %s3501_s24   ;;  %s2836_s26 = sadd.s32 4294967294, %s3501_s24   ;;  %s3501_s24 = sphi %s3560_s24, %s4360_s24   ;;  %s3497_s23 = sphi %s3558_s23, %s4359_s23   ;;  %s3493_s22 = sphi %s3556_s22, %s4358_s22   ;;  %s3489_s21 = sphi %s3554_s21, %s4357_s21  }
   0x6   : > { %s3579_s27 = sadd.s32 1, %s3501_s24   ;;  %s29_s28 = sadd.s32 1, %s3497_s23 }
   0x7   : > { %s26_s29 = ssub.s32 %s3501_s24, %s3579_s27  ;;  %p36_p0 = scmp.ne.s32.totalorder %s3497_s23, %s3493_s22 }
   0x8   : > { %p27_p1 = scmp.eq.s32.totalorder %s26_s29, 0  ;;  %p37_p2 = scmp.eq.s32.totalorder %s3501_s24, 0 }
   0x9   : > { %p42_p3 = scmp.ne.s32.totalorder %s3493_s22, %s3489_s21  ;;  %p43_p4 = scmp.eq.s32.totalorder %s3575_s25, 0 }
   0xa   : > { %s3591_s30 = scalar_select %p27_p1, %s3497_s23, %s29_s28  }
   0xb   : > { %p3593_p5 = por %p37_p2, %p36_p0  ;;  %p3597_p6 = por %p43_p4, %p42_p3 }
   0xc   : > { %p171_p7 = scmp.eq.s32.totalorder %s3575_s25, 1  ;;  %p177_p8 = scmp.eq.s32.totalorder %s2836_s26, 1 }
   0xd   : > { %p3203_p10 = scmp.lt.s32.totalorder %s3501_s24, 2  ;;  %s212_s11 = sand.u32 1, %s3497_s23  }
   0xe   : > { %p3604_p11 = por %p171_p7, %p36_p0  ;;  %p3608_p12 = por %p177_p8, %p42_p3 }
   0xf   : > { %s2904_s12 = sshll.u32 %s3501_s24, 10  ;;  %s2839_s13 = sshll.u32 %s212_s11, 6 }
  0x10   : > { %s4351_s9 = scalar_select %p3604_p11, 1, 0 }
  0x11   : > { %s4352_s10 = scalar_select %p3608_p12, 1, 0 }
  0x12   : > { %s3617_s16 = scalar_lea.hbm %s4341_s0, %s2904_s12  ;;  %s216_s17 = scalar_lea.vmem [#allocation3], %s2839_s13 }
  0x13   : > { %s224_s18 = sshll.u32 %s216_s17, 4  ;;  %p3621_p13 = pnand %p3203_p10, %p3593_p5  ;;  %s3625_s18 = int_to_ptr.vmem [resolvable:$true] %s224_s18 }
  0x14   : > { %s3627_s20 = scalar_lea.sflag [#allocation4], %s212_s11  ;;  %s3405_s26 = scalar_lea.hbm %s3617_s16, 1024 }
  0x15   : > { %p3406_p0 = scmp.ne.s32.totalorder %s3617_s16, %s3405_s26  ;;  %p3407_p1 = pneg %p3621_p13 }
  0x16   : > { %s3410_s7 = scalar_lea.hbm %s4341_s0, 2048  ;;  %p3411_p4 = scmp.lt.u32.totalorder %s3617_s16, %s4341_s0 }
  0x17   : > { %p3408_p2 = pnand %p3407_p1, %p3406_p0  ;;  %p3412_p5 = scmp.lt.u32.totalorder %s3410_s7, %s3405_s26 }
  0x18   : > { %p3414_p8 = scmp.lt.u32.totalorder %s3405_s26, %s3617_s16 }
  0x19   : > { %p3409_p3 = pneg %p3408_p2  ;;  %p3413_p7 = por %p3412_p5, %p3411_p4 }
  0x1b   : > { %p3415_p10 = por %p3414_p8, %p3413_p7 }
  0x1d   : > { %p3416_p9 = pnand %p3415_p10, %p3409_p3 }
  0x1f   : > { %3419 = shalt.err (!%p3416_p9)
}
  0x20   : > { %s3420_s11 = scalar_lea.vmem %s3625_s18, 1024  ;;  %s3503_s14 = smov [#allocation3]  }
  0x21   : > { %p3421_p0 = scmp.ne.s32.totalorder %s3625_s18, %s3420_s11  ;;  %s3425_s15 = sshll.u32 %s3503_s14, 4  ;;  %s3426_s15 = int_to_ptr.vmem [resolvable:$false] %s3425_s15 }
  0x22   : > { %s3427_s17 = scalar_lea.vmem %s3426_s15, 2048  ;;  %p3428_p11 = scmp.lt.s32.totalorder %s3625_s18, %s3426_s15 }
  0x23   : > { %p3423_p2 = pnand %p3421_p0, %p3407_p1  ;;  %p3429_p4 = scmp.lt.s32.totalorder %s3427_s17, %s3420_s11 }
  0x25   : > { %p3424_p12 = pneg %p3423_p2  ;;  %p3430_p5 = por %p3429_p4, %p3428_p11 }
  0x27   : > { %p3431_p7 = pnand %p3430_p5, %p3424_p12 }
  0x29   : > { %3434 = shalt.err (!%p3431_p7)
}
  0x2a   : > { %s3504_s26 = smov 128   ;;  %s3505_s28 = smov 8  }
  0x2b   : > { %3198 = dma.hbm_to_vmem [thread:$0]  (!%p3621_p13), %s3617_s16, 1024, %s3625_s18, %s3627_s20, %s3504_s26, %s3504_s26, %s3505_s28  }
  0x2c   : > { %p2843_p9 = scmp.ge.s32.totalorder %s3501_s24, 1  ;;  %p232_p1 = scmp.lt.s32.totalorder %s3501_s24, 3 }
  0x2e   : > { %p233_p3 = pnand %p2843_p9, %p232_p1 }
  0x2f   : > { %s3658_s29 = sand.u32 (!%p233_p3), 1, %s3493_s22  }
  0x30   : > { %236 = sbr.rel (%p233_p3) target bundleno = 3684 (0xe64), region = 44  ;;  %s2844_s7 = sshll.u32 (!%p233_p3), %s3658_s29, 6 }
  0x31   : > { %s239_s12 = scalar_lea.sflag (!%p233_p3), [#allocation4], %s3658_s29  ;;  %s242_s13 = scalar_lea.vmem (!%p233_p3), [#allocation3], %s2844_s7 }
  0x37   : > { %3480 = dma.done.wait (%p3597_p6), %s239_s12, 1024  }
  0x38   : > { %3482 = vsyncadd (%p3597_p6), %s239_s12, 4294966272  ;;  %vm284_vm0 = vcmask 261120   ;;  %v274_v0 = vld [vmem:[%s242_s13] sm:$0xff]  ;;  %v276_v1 = vld [vmem:[%s242_s13 + $0x10] sm:$0xff]  ;;  %v3506_v60 = vmov 0   ;;  %vm3508_vm1 = vmmov 0  }
  0x39   : > { %v275_v2 = vld [vmem:[%s242_s13 + $0x8] sm:$0xff]  ;;  %v285_v3 = vsel %vm284_vm0, %v274_v0, 0.0  ;;  %v291_v4 = vsel %vm284_vm0, %v276_v1, 0.0  ;;  %v277_v5 = vld [vmem:[%s242_s13 + $0x18] sm:$0xff]  ;;  %v278_v6 = vld [vmem:[%s242_s13 + $0x20] sm:$0xff]  ;;  %490 = vmatprep.mubr.bf16.mxu0 %v3506_v60  ;;  %520 = vmatprep.mubr.bf16.mxu1 %v3506_v60  ;;  %vm554_vm2 = vcmask 130048  }
  0x3a   : > { %286 = vadd.xlane.f32.xlu0 %v285_v3  ;;  %292 = vadd.xlane.f32.xlu1 %v291_v4  ;;  %v279_v7 = vld [vmem:[%s242_s13 + $0x28] sm:$0xff]  ;;  %v288_v8 = vsel %vm284_vm0, %v275_v2, 0.0  ;;  %v294_v9 = vsel %vm284_vm0, %v277_v5, 0.0  ;;  %v297_v10 = vsel %vm284_vm0, %v278_v6, 0.0  ;;  %v280_v12 = vld [vmem:[%s242_s13 + $0x30] sm:$0xff]  ;;  %v281_v13 = vld [vmem:[%s242_s13 + $0x38] sm:$0xff] }
  0x3b   : > { %v300_v11 = vsel %vm284_vm0, %v279_v7, 0.0  ;;  %v303_v14 = vsel %vm284_vm0, %v280_v12, 0.0  ;;  %v306_v15 = vsel %vm284_vm0, %v281_v13, 0.0  ;;  %v3251_v56 = vld [vmem:[%s4344_s3 + $0x4] ss:$8 sps:$4 sm:$0xff]   ;;  %s3509_s13 = smov 64  }
  0x3c   : > { %v3253_v57 = vld [vmem:[%s4344_s3] ss:$8 sps:$4 sm:$0xff]   ;;  %458 = vmatprep.subr.bf16.mxu0 %v3251_v56  ;;  %v3254_v58 = vld [vmem:[%s4344_s3 + $0x14] ss:$8 sps:$4 sm:$0xff]   ;;  %3187 = vmatprep.subr.bf16.mxu1 %v3251_v56  ;;  %v3256_v59 = vld [vmem:[%s4344_s3 + $0x10] ss:$8 sps:$4 sm:$0xff]  }
  0x3d   : > { %459 = vmatpush1.bf16.msra.mxu0 %v3253_v57  ;;  %3189 = vmatpush1.bf16.msra.mxu1 %v3253_v57  ;;  %s3510_s8 = smov 48   ;;  %s3511_s16 = smov 112   ;;  %vm1552_vm3 = vcmask 261248   ;;  %vm2077_vm4 = vcmask 392448   ;;  %vm2602_vm5 = vcmask 523648   ;;  %vm2662_vm6 = vcmask 523264  }
  0x3e   : > { %289 = vadd.xlane.f32.xlu0 %v288_v8  ;;  %295 = vadd.xlane.f32.xlu1 %v294_v9  ;;  %s3512_s18 = smov 32   ;;  %s3513_s19 = smov 96  }
  0x3f   : > { %460 = vmatprep.subr.bf16.mxu0 %v3254_v58  ;;  %3188 = vmatprep.subr.bf16.mxu1 %v3254_v58  ;;  %s3514_s20 = smov 16   ;;  %s3515_s11 = smov 80  }
  0x40   : > { %p4354_p11 = scmp.ne.s32.totalorder %s4351_s9, 0  ;;  %s3516_s26 = smov [#allocation6]  }
  0x41   : > { %461 = vmatpush1.bf16.msra.mxu0 %v3256_v59  ;;  %3190 = vmatpush1.bf16.msra.mxu1 %v3256_v59  ;;  %s3439_s28 = sshll.u32 %s3516_s26, 4  ;;  %s3440_s28 = int_to_ptr.vmem [resolvable:$false] %s3439_s28 }
  0x42   : > { %298 = vadd.xlane.f32.xlu0 %v297_v10  ;;  %301 = vadd.xlane.f32.xlu1 %v300_v11  ;;  %s3441_s12 = scalar_lea.vmem %s3440_s28, 2048 }
  0x46   : > { %304 = vadd.xlane.f32.xlu0 %v303_v14  ;;  %307 = vadd.xlane.f32.xlu1 %v306_v15 }
  0xc7   : > { %v287_v16 = vpop.xlane.xlu0 %286  ;;  %v293_v17 = vpop.xlane.xlu1 %292 }
  0xc8   : > { %v310_v18 = vmul.f32 0.03125, %v287_v16  ;;  %v312_v19 = vmul.f32 0.03125, %v293_v17 }
  0xca   : > { %v3676_v20 = vsub.f32 %v274_v0, %v310_v18  ;;  %v3678_v21 = vsub.f32 %v276_v1, %v312_v19 }
  0xcb   : > { %v290_v22 = vpop.xlane.xlu0 %289  ;;  %v296_v23 = vpop.xlane.xlu1 %295 }
  0xcc   : > { %v311_v24 = vmul.f32 0.03125, %v290_v22  ;;  %v313_v25 = vmul.f32 0.03125, %v296_v23  ;;  %v326_v26 = vmul.f32 %v3676_v20, %v3676_v20  ;;  %v328_v27 = vmul.f32 %v3678_v21, %v3678_v21 }
  0xce   : > { %v3684_v28 = vsub.f32 %v275_v2, %v311_v24  ;;  %v3686_v29 = vsub.f32 %v277_v5, %v313_v25  ;;  %v334_v30 = vsel %vm284_vm0, %v326_v26, 0.0  ;;  %v340_v33 = vsel %vm284_vm0, %v328_v27, 0.0  ;;  %v2846_v24 = vld [vmem:[%s4342_s1] ss:$0 sm:$0xff] }
  0xcf   : > { %335 = vadd.xlane.f32.xlu0 %v334_v30  ;;  %v299_v31 = vpop.xlane.xlu0 %298  ;;  %v302_v32 = vpop.xlane.xlu1 %301 }
  0xd0   : > { %v314_v34 = vmul.f32 0.03125, %v299_v31  ;;  %v315_v35 = vmul.f32 0.03125, %v302_v32  ;;  %v327_v36 = vmul.f32 %v3684_v28, %v3684_v28  ;;  %v329_v37 = vmul.f32 %v3686_v29, %v3686_v29  ;;  %v2847_v32 = vld [vmem:[%s4343_s2] ss:$0 sm:$0xff] }
  0xd2   : > { %v3694_v38 = vsub.f32 %v278_v6, %v314_v34  ;;  %v3696_v39 = vsub.f32 %v279_v7, %v315_v35  ;;  %v337_v40 = vsel %vm284_vm0, %v327_v36, 0.0  ;;  %v343_v43 = vsel %vm284_vm0, %v329_v37, 0.0 }
  0xd3   : > { %341 = vadd.xlane.f32.xlu0 %v340_v33  ;;  %338 = vadd.xlane.f32.xlu1 %v337_v40  ;;  %v305_v41 = vpop.xlane.xlu0 %304  ;;  %v308_v42 = vpop.xlane.xlu1 %307 }
  0xd4   : > { %v316_v44 = vmul.f32 0.03125, %v305_v41  ;;  %v317_v45 = vmul.f32 0.03125, %v308_v42  ;;  %v330_v46 = vmul.f32 %v3694_v38, %v3694_v38  ;;  %v331_v47 = vmul.f32 %v3696_v39, %v3696_v39 }
  0xd6   : > { %v3704_v48 = vsub.f32 %v280_v12, %v316_v44  ;;  %v3706_v49 = vsub.f32 %v281_v13, %v317_v45  ;;  %v346_v50 = vsel %vm284_vm0, %v330_v46, 0.0  ;;  %v349_v51 = vsel %vm284_vm0, %v331_v47, 0.0 }
  0xd7   : > { %344 = vadd.xlane.f32.xlu1 %v343_v43  ;;  %347 = vadd.xlane.f32.xlu0 %v346_v50 }
  0xd8   : > { %v332_v52 = vmul.f32 %v3704_v48, %v3704_v48  ;;  %v333_v53 = vmul.f32 %v3706_v49, %v3706_v49 }
  0xda   : > { %v352_v54 = vsel %vm284_vm0, %v332_v52, 0.0  ;;  %v355_v55 = vsel %vm284_vm0, %v333_v53, 0.0 }
  0xdb   : > { %350 = vadd.xlane.f32.xlu1 %v349_v51  ;;  %353 = vadd.xlane.f32.xlu0 %v352_v54 }
  0xdf   : > { %356 = vadd.xlane.f32.xlu1 %v355_v55 }
 0x15c   : > { %v336_v61 = vpop.xlane.xlu0 %335 }
 0x15d   : > { %v358_v62 = vmul.f32 0.03125, %v336_v61 }
 0x15f   : > { %v366_v63 = vadd.f32 1e-05, %v358_v62 }
 0x160   : > { %v339_v0 = vpop.xlane.xlu1 %338  ;;  %v342_v1 = vpop.xlane.xlu0 %341 }
 0x161   : > { %3261 = vrsqrt.f32 %v366_v63  ;;  %v359_v2 = vmul.f32 0.03125, %v339_v0  ;;  %v360_v3 = vmul.f32 0.03125, %v342_v1 }
 0x163   : > { %v367_v4 = vadd.f32 1e-05, %v359_v2  ;;  %v368_v5 = vadd.f32 1e-05, %v360_v3 }
 0x164   : > { %v345_v6 = vpop.xlane.xlu1 %344  ;;  %v348_v7 = vpop.xlane.xlu0 %347 }
 0x165   : > { %3263 = vrsqrt.f32 %v367_v4  ;;  %v361_v8 = vmul.f32 0.03125, %v345_v6  ;;  %v362_v10 = vmul.f32 0.03125, %v348_v7 }
 0x166   : > { %3265 = vrsqrt.f32 %v368_v5 }
 0x167   : > { %v369_v9 = vadd.f32 1e-05, %v361_v8  ;;  %v370_v16 = vadd.f32 1e-05, %v362_v10 }
 0x168   : > { %v351_v11 = vpop.xlane.xlu1 %350  ;;  %v354_v12 = vpop.xlane.xlu0 %353 }
 0x169   : > { %3267 = vrsqrt.f32 %v369_v9  ;;  %v363_v13 = vmul.f32 0.03125, %v351_v11  ;;  %v364_v14 = vmul.f32 0.03125, %v354_v12 }
 0x16b   : > { %v3262_v15 = vpop.eup %3261  ;;  %v371_v17 = vadd.f32 1e-05, %v363_v13  ;;  %v372_v18 = vadd.f32 1e-05, %v364_v14 }
 0x16c   : > { %v357_v19 = vpop.xlane.xlu1 %356  ;;  %v382_v22 = vmul.f32 %v3262_v15, %v3676_v20 }
 0x16d   : > { %3269 = vrsqrt.f32 %v371_v17  ;;  %v365_v23 = vmul.f32 0.03125, %v357_v19 }
 0x16e   : > { %3271 = vrsqrt.f32 %v372_v18  ;;  %v396_v30 = vmul.f32 %v2846_v24, %v382_v22 }
 0x16f   : > { %v3264_v25 = vpop.eup %3263  ;;  %3273 = vrsqrt.f32 %v370_v16  ;;  %v373_v26 = vadd.f32 1e-05, %v365_v23 }
 0x170   : > { %v383_v27 = vmul.f32 %v3264_v25, %v3684_v28  ;;  %v3266_v31 = vpop.eup %3265  ;;  %v410_v34 = vadd.f32 %v2847_v32, %v396_v30 }
 0x171   : > { %3275 = vrsqrt.f32 %v373_v26  ;;  %v384_v36 = vmul.f32 %v3266_v31, %v3678_v21 }
 0x172   : > { %v397_v20 = vmul.f32 %v2846_v24, %v383_v27 }
 0x173   : > { %v3268_v33 = vpop.eup %3267  ;;  %v398_v28 = vmul.f32 %v2846_v24, %v384_v36 }
 0x174   : > { %v411_v35 = vadd.f32 %v2847_v32, %v397_v20  ;;  %v385_v37 = vmul.f32 %v3268_v33, %v3686_v29 }
 0x175   : > { %v412_v51 = vadd.f32 %v2847_v32, %v398_v28 }
 0x176   : > { %v418_v40 = vpack.c.bf16 %v411_v35, %v410_v34  ;;  %v399_v41 = vmul.f32 %v2846_v24, %v385_v37 }
 0x177   : > { %v3270_v42 = vpop.eup %3269 }
 0x178   : > { %v3272_v43 = vpop.eup %3271  ;;  %2852 = vmatmul.mubr.msk.bf16.vlgmr.msra.gmra.mrb[0].mxu0 %vm284_vm0, %v418_v40  ;;  %v413_v46 = vadd.f32 %v2847_v32, %v399_v41  ;;  %v387_v47 = vmul.f32 %v3270_v42, %v3696_v39 }
 0x179   : > { %v3274_v44 = vpop.eup %3273  ;;  %500 = vmatprep.mubr.bf16.mxu0 %v3506_v60  ;;  %v388_v45 = vmul.f32 %v3272_v43, %v3704_v48 }
 0x17a   : > { %v386_v52 = vmul.f32 %v3274_v44, %v3694_v38  ;;  %v419_v53 = vpack.c.bf16 %v413_v46, %v412_v51  ;;  %v401_v55 = vmul.f32 %v2846_v24, %v387_v47 }
 0x17b   : > { %v3276_v50 = vpop.eup %3275  ;;  %v402_v29 = vmul.f32 %v2846_v24, %v388_v45 }
 0x17c   : > { %v389_v21 = vmul.f32 %v3276_v50, %v3706_v49  ;;  %v400_v58 = vmul.f32 %v2846_v24, %v386_v52  ;;  %v415_v59 = vadd.f32 %v2847_v32, %v401_v55  ;;  %v3507_v49 = vmov 0.0  }
 0x17d   : > { %v416_v56 = vadd.f32 %v2847_v32, %v402_v29  ;;  %3003 = vmatprep.subr.bf16.mxu0 %v3507_v49  ;;  %2979 = vmatprep.subr.bf16.mxu1 %v3507_v49 }
 0x17e   : > { %v403_v54 = vmul.f32 %v2846_v24, %v389_v21  ;;  %v414_v39 = vadd.f32 %v2847_v32, %v400_v58 }
 0x180   : > { %2853 = vmatmul.mubr.msk.bf16.gmra.mrb[4].mxu0 %vm284_vm0, %v419_v53  ;;  %v417_v57 = vadd.f32 %v2847_v32, %v403_v54  ;;  %v420_v61 = vpack.c.bf16 %v415_v59, %v414_v39 }
 0x181   : > { %510 = vmatprep.mubr.bf16.mxu0 %v3506_v60 }
 0x182   : > { %v421_v48 = vpack.c.bf16 %v417_v57, %v416_v56 }
 0x184   : > { %2855 = vmatmul.mubr.msk.bf16.vlgmr.msra.gmra.mrb[0].mxu1 %vm284_vm0, %v421_v48 }
 0x185   : > { %2981 = vmatprep.mubr.msk.bf16.mxu1 %vm3508_vm1, %v3507_v49 }
 0x188   : > { %2854 = vmatmul.mubr.msk.bf16.gmra.mrb[8].mxu0 %vm284_vm0, %v420_v61 }
 0x189   : > { %3005 = vmatprep.mubr.msk.bf16.mxu0 %vm3508_vm1, %v3507_v49 }
 0x24b   : > { %v492_v38 = vpop.f32.mrb[0].mxu0 }
 0x24c   : > { %v494_v60 = vpop.f32.mrb[1].mxu0  ;;  %v531_v63 = vmul.f32 0.25, %v492_v38 }
 0x24d   : > { %v496_v62 = vpop.f32.mrb[2].mxu0 }
 0x24e   : > { %v532_v0 = vmul.f32 0.25, %v496_v62  ;;  %v3756_v1 = vpack.c.bf16 %v496_v62, %v492_v38  ;;  %v498_v2 = vpop.f32.mrb[3].mxu0 }
 0x24f   : > { %v3758_v3 = vpack.c.bf16 %v498_v2, %v494_v60 }
 0x250   : > { %v3760_v4 = vpack.c.bf16 %v532_v0, %v531_v63  ;;  %552 = vrot.lane.b32.xlu0 %v3756_v1, %s3509_s13 }
 0x251   : > { %3004 = vmatpush3.bf16.msra.mxu0 %v3758_v3 }
 0x252   : > { %3015 = vmatprep.subr.bf16.mxu0 %v3507_v49 }
 0x253   : > { %v502_v5 = vpop.f32.mrb[4].mxu0 }
 0x254   : > { %v504_v6 = vpop.f32.mrb[5].mxu0  ;;  %v533_v8 = vmul.f32 0.25, %v502_v5 }
 0x255   : > { %v506_v7 = vpop.f32.mrb[6].mxu0 }
 0x256   : > { %v534_v9 = vmul.f32 0.25, %v506_v7  ;;  %v3766_v10 = vpack.c.bf16 %v506_v7, %v502_v5  ;;  %v508_v11 = vpop.f32.mrb[7].mxu0 }
 0x257   : > { %v3768_v12 = vpack.c.bf16 %v508_v11, %v504_v6  ;;  %v522_v13 = vpop.f32.mrb[0].mxu1 }
 0x258   : > { %v3770_v14 = vpack.c.bf16 %v534_v9, %v533_v8  ;;  %603 = vrot.lane.b32.xlu1 %v3766_v10, %s3509_s13  ;;  %v524_v15 = vpop.f32.mrb[1].mxu1  ;;  %v537_v17 = vmul.f32 0.25, %v522_v13 }
 0x259   : > { %v526_v16 = vpop.f32.mrb[2].mxu1 }
 0x25a   : > { %v538_v18 = vmul.f32 0.25, %v526_v16  ;;  %v3774_v19 = vpack.c.bf16 %v526_v16, %v522_v13  ;;  %v528_v22 = vpop.f32.mrb[3].mxu1 }
 0x25b   : > { %v3776_v23 = vpack.c.bf16 %v528_v22, %v524_v15  ;;  %v512_v24 = vpop.f32.mrb[8].mxu0 }
 0x25c   : > { %v3778_v25 = vpack.c.bf16 %v538_v18, %v537_v17  ;;  %v514_v26 = vpop.f32.mrb[9].mxu0  ;;  %v535_v30 = vmul.f32 0.25, %v512_v24 }
 0x25d   : > { %v516_v27 = vpop.f32.mrb[10].mxu0 }
 0x25e   : > { %v536_v31 = vmul.f32 0.25, %v516_v27  ;;  %v3780_v32 = vpack.c.bf16 %v516_v27, %v512_v24  ;;  %v518_v20 = vpop.f32.mrb[11].mxu0 }
 0x25f   : > { %v3782_v33 = vpack.c.bf16 %v518_v20, %v514_v26 }
 0x260   : > { %v3784_v34 = vpack.c.bf16 %v536_v31, %v535_v30  ;;  %653 = vrot.lane.b32.xlu1 %v3780_v32, %s3509_s13 }
 0x264   : > { %703 = vrot.lane.b32.xlu1 %v3774_v19, %s3509_s13 }
 0x2c2   : > { %v553_v35 = vpop.permute.xlu0 %552 }
 0x2c3   : > { %v559_v36 = vsel %vm554_vm2, %v553_v35, 0 }
 0x2c4   : > { %2980 = vmatpush3.bf16.xpose.msra.mxu1 %v559_v36 }
 0x2c5   : > { %2985 = vmatprep.subr.bf16.mxu1 %v3507_v49 }
 0x2ca   : > { %v604_v37 = vpop.permute.xlu1 %603 }
 0x2cb   : > { %v609_v40 = vsel %vm554_vm2, %v604_v37, 0  ;;  %2982 = vmatmul.mubr.msk.bf16.vlgmr.msra.gmra.mrb[4].mxu1 %vm554_vm2, %v3760_v4 }
 0x2cc   : > { %2986 = vmatpush3.bf16.xpose.msra.mxu1 %v609_v40  ;;  %2987 = vmatprep.mubr.msk.bf16.mxu1 %vm3508_vm1, %v3507_v49 }
 0x2cd   : > { %2991 = vmatprep.subr.bf16.mxu1 %v3507_v49 }
 0x2d2   : > { %v654_v41 = vpop.permute.xlu1 %653 }
 0x2d3   : > { %v659_v42 = vsel %vm554_vm2, %v654_v41, 0  ;;  %2988 = vmatmul.mubr.msk.bf16.vlgmr.msra.gmra.mrb[8].mxu1 %vm554_vm2, %v3770_v14 }
 0x2d4   : > { %2992 = vmatpush3.bf16.xpose.msra.mxu1 %v659_v42  ;;  %2993 = vmatprep.mubr.msk.bf16.mxu1 %vm3508_vm1, %v3507_v49 }
 0x2d5   : > { %2997 = vmatprep.subr.bf16.mxu1 %v3507_v49 }
 0x2d6   : > { %v704_v43 = vpop.permute.xlu1 %703 }
 0x2d7   : > { %v709_v28 = vsel %vm554_vm2, %v704_v43, 0 }
 0x2db   : > { %2994 = vmatmul.mubr.msk.bf16.vlgmr.msra.gmra.mrb[12].mxu1 %vm554_vm2, %v3784_v34 }
 0x2dc   : > { %2998 = vmatpush3.bf16.xpose.msra.mxu1 %v709_v28  ;;  %2999 = vmatprep.mubr.msk.bf16.mxu1 %vm3508_vm1, %v3507_v49 }
 0x2dd   : > { %3009 = vmatprep.subr.bf16.mxu1 %v3507_v49 }
 0x2e3   : > { %3000 = vmatmul.mubr.msk.bf16.vlgmr.msra.gmra.mrb[16].mxu1 %vm554_vm2, %v3778_v25 }
 0x2e4   : > { %3010 = vmatpush3.bf16.msra.mxu1 %v3768_v12  ;;  %3011 = vmatprep.mubr.msk.bf16.mxu1 %vm3508_vm1, %v3507_v49 }
 0x2e5   : > { %3021 = vmatprep.subr.bf16.mxu1 %v3507_v49 }
 0x39e   : > { %v595_v44 = vpop.f32.mrb[4].mxu1 }
 0x39f   : > { %v2983_v45 = vpop.f32.mrb[5].mxu1  ;;  %v752_v46 = vsel %vm554_vm2, %v595_v44, -inf }
 0x3a0   : > { %753 = vmax.xlane.f32.xlu0 %v752_v46  ;;  %v598_v47 = vpop.f32.mrb[6].mxu1 }
 0x3a1   : > { %v2984_v50 = vpop.f32.mrb[7].mxu1  ;;  %v755_v51 = vsel %vm554_vm2, %v598_v47, -inf }
 0x3a2   : > { %756 = vmax.xlane.f32.xlu1 %v755_v51 }
 0x3a6   : > { %v645_v21 = vpop.f32.mrb[8].mxu1 }
 0x3a7   : > { %v2989_v29 = vpop.f32.mrb[9].mxu1  ;;  %v758_v52 = vsel %vm554_vm2, %v645_v21, -inf }
 0x3a8   : > { %759 = vmax.xlane.f32.xlu0 %v758_v52  ;;  %v648_v53 = vpop.f32.mrb[10].mxu1 }
 0x3a9   : > { %v2990_v54 = vpop.f32.mrb[11].mxu1  ;;  %v761_v55 = vsel %vm554_vm2, %v648_v53, -inf }
 0x3ac   : > { %762 = vmax.xlane.f32.xlu0 %v761_v55 }
 0x3ae   : > { %v695_v56 = vpop.f32.mrb[12].mxu1 }
 0x3af   : > { %v2995_v57 = vpop.f32.mrb[13].mxu1  ;;  %v764_v58 = vsel %vm554_vm2, %v695_v56, -inf }
 0x3b0   : > { %765 = vmax.xlane.f32.xlu0 %v764_v58  ;;  %v698_v48 = vpop.f32.mrb[14].mxu1 }
 0x3b1   : > { %v2996_v59 = vpop.f32.mrb[15].mxu1  ;;  %v767_v39 = vsel %vm554_vm2, %v698_v48, -inf }
 0x3b2   : > { %768 = vmax.xlane.f32.xlu1 %v767_v39 }
 0x3b6   : > { %v745_v61 = vpop.f32.mrb[16].mxu1 }
 0x3b7   : > { %v3001_v38 = vpop.f32.mrb[17].mxu1  ;;  %v770_v60 = vsel %vm554_vm2, %v745_v61, -inf }
 0x3b8   : > { %771 = vmax.xlane.f32.xlu0 %v770_v60  ;;  %v748_v62 = vpop.f32.mrb[18].mxu1 }
 0x3b9   : > { %v3002_v63 = vpop.f32.mrb[19].mxu1  ;;  %v773_v0 = vsel %vm554_vm2, %v748_v62, -inf }
 0x3ba   : > { %774 = vmax.xlane.f32.xlu1 %v773_v0 }
 0x42d   : > { %v754_v2 = vpop.xlane.xlu0 %753 }
 0x42e   : > { %v776_v5 = vsub.f32 %v595_v44, %v754_v2 }
 0x42f   : > { %v757_v6 = vpop.xlane.xlu1 %756 }
 0x430   : > { %v784_v7 = vmul.f32 1.442695, %v776_v5  ;;  %v777_v8 = vsub.f32 %v598_v47, %v757_v6 }
 0x432   : > { %3277 = vpow2.f32 %v784_v7  ;;  %v786_v9 = vmul.f32 1.442695, %v777_v8 }
 0x434   : > { %3279 = vpow2.f32 %v786_v9 }
 0x435   : > { %v760_v11 = vpop.xlane.xlu0 %759 }
 0x436   : > { %v778_v13 = vsub.f32 %v645_v21, %v760_v11 }
 0x438   : > { %v788_v15 = vmul.f32 1.442695, %v778_v13 }
 0x439   : > { %v763_v16 = vpop.xlane.xlu0 %762 }
 0x43a   : > { %3281 = vpow2.f32 %v788_v15  ;;  %v779_v17 = vsub.f32 %v648_v53, %v763_v16 }
 0x43c   : > { %v3278_v18 = vpop.eup %3277  ;;  %v790_v22 = vmul.f32 1.442695, %v779_v17 }
 0x43d   : > { %v766_v24 = vpop.xlane.xlu0 %765  ;;  %v800_v26 = vsel %vm554_vm2, %v3278_v18, 0.0 }
 0x43e   : > { %v3280_v27 = vpop.eup %3279  ;;  %3283 = vpow2.f32 %v790_v22  ;;  %v780_v30 = vsub.f32 %v695_v56, %v766_v24  ;;  %801 = vadd.xlane.f32.xlu0 %v800_v26 }
 0x43f   : > { %v769_v31 = vpop.xlane.xlu1 %768  ;;  %v803_v20 = vsel %vm554_vm2, %v3280_v27, 0.0 }
 0x440   : > { %v792_v35 = vmul.f32 1.442695, %v780_v30  ;;  %v781_v36 = vsub.f32 %v698_v48, %v769_v31  ;;  %804 = vadd.xlane.f32.xlu1 %v803_v20 }
 0x442   : > { %3285 = vpow2.f32 %v792_v35  ;;  %v794_v37 = vmul.f32 1.442695, %v781_v36 }
 0x444   : > { %v3282_v40 = vpop.eup %3281  ;;  %3287 = vpow2.f32 %v794_v37 }
 0x445   : > { %v772_v41 = vpop.xlane.xlu0 %771  ;;  %v806_v42 = vsel %vm554_vm2, %v3282_v40, 0.0 }
 0x446   : > { %v782_v43 = vsub.f32 %v745_v61, %v772_v41  ;;  %807 = vadd.xlane.f32.xlu0 %v806_v42 }
 0x447   : > { %v775_v52 = vpop.xlane.xlu1 %774 }
 0x448   : > { %v3284_v28 = vpop.eup %3283  ;;  %v796_v44 = vmul.f32 1.442695, %v782_v43  ;;  %v783_v53 = vsub.f32 %v748_v62, %v775_v52 }
 0x449   : > { %v809_v45 = vsel %vm554_vm2, %v3284_v28, 0.0 }
 0x44a   : > { %3289 = vpow2.f32 %v796_v44  ;;  %810 = vadd.xlane.f32.xlu1 %v809_v45  ;;  %v798_v54 = vmul.f32 1.442695, %v783_v53 }
 0x44c   : > { %v3286_v46 = vpop.eup %3285  ;;  %3291 = vpow2.f32 %v798_v54 }
 0x44d   : > { %v812_v47 = vsel %vm554_vm2, %v3286_v46, 0.0 }
 0x44e   : > { %v3288_v50 = vpop.eup %3287  ;;  %813 = vadd.xlane.f32.xlu0 %v812_v47 }
 0x44f   : > { %v815_v51 = vsel %vm554_vm2, %v3288_v50, 0.0 }
 0x450   : > { %816 = vadd.xlane.f32.xlu1 %v815_v51 }
 0x454   : > { %v3830_v21 = vpop.eup %3289 }
 0x455   : > { %v818_v29 = vsel %vm554_vm2, %v3830_v21, 0.0 }
 0x456   : > { %819 = vadd.xlane.f32.xlu0 %v818_v29  ;;  %v3844_v55 = vpop.eup %3291 }
 0x457   : > { %v821_v56 = vsel %vm554_vm2, %v3844_v55, 0.0 }
 0x461   : > { %1083 = vrot.lane.b32.xlu1 %v3766_v10, %s3510_s8 }
 0x465   : > { %1029 = vrot.lane.b32.xlu1 %v3760_v4, %s3511_s16 }
 0x46c   : > { %1031 = vrot.lane.b32.xlu0 %v3756_v1, %s3510_s8 }
 0x470   : > { %1081 = vrot.lane.b32.xlu0 %v3770_v14, %s3511_s16 }
 0x474   : > { %1133 = vrot.lane.b32.xlu0 %v3784_v34, %s3511_s16 }
 0x489   : > { %822 = vadd.xlane.f32.xlu1 %v821_v56 }
 0x49a   : > { %1135 = vrot.lane.b32.xlu1 %v3780_v32, %s3510_s8 }
 0x49e   : > { %1187 = vrot.lane.b32.xlu1 %v3774_v19, %s3510_s8 }
 0x4a2   : > { %1185 = vrot.lane.b32.xlu1 %v3778_v25, %s3511_s16 }
 0x4cb   : > { %v802_v57 = vpop.xlane.xlu0 %801 }
 0x4cc   : > { %3293 = vrcp.f32 %v802_v57 }
 0x4cd   : > { %v805_v58 = vpop.xlane.xlu1 %804 }
 0x4ce   : > { %3295 = vrcp.f32 %v805_v58 }
 0x4d3   : > { %v808_v48 = vpop.xlane.xlu0 %807 }
 0x4d4   : > { %3297 = vrcp.f32 %v808_v48 }
 0x4d6   : > { %v3294_v59 = vpop.eup %3293 }
 0x4d7   : > { %v811_v39 = vpop.xlane.xlu1 %810  ;;  %v832_v38 = vmul.f32 %v3294_v59, %v3278_v18 }
 0x4d8   : > { %v3296_v61 = vpop.eup %3295  ;;  %3299 = vrcp.f32 %v811_v39 }
 0x4d9   : > { %v833_v60 = vmul.f32 %v3296_v61, %v3280_v27 }
 0x4db   : > { %v840_v62 = vpack.c.bf16 %v833_v60, %v832_v38  ;;  %v814_v63 = vpop.xlane.xlu0 %813 }
 0x4dc   : > { %3301 = vrcp.f32 %v814_v63 }
 0x4dd   : > { %3006 = vmatmul.mubr.msk.bf16.vlgmr.msra.gmra.mrb[12].mxu0 %vm554_vm2, %v840_v62  ;;  %v817_v0 = vpop.xlane.xlu1 %816 }
 0x4de   : > { %3016 = vmatpush3.bf16.msra.mxu0 %v3782_v33  ;;  %3303 = vrcp.f32 %v817_v0  ;;  %3017 = vmatprep.mubr.msk.bf16.mxu0 %vm3508_vm1, %v3507_v49  ;;  %v3298_v2 = vpop.eup %3297 }
 0x4df   : > { %3027 = vmatprep.subr.bf16.mxu0 %v3507_v49  ;;  %v834_v6 = vmul.f32 %v3298_v2, %v3282_v40 }
 0x4e1   : > { %v1084_v24 = vpop.permute.xlu1 %1083 }
 0x4e2   : > { %v3300_v5 = vpop.eup %3299  ;;  %v1089_v43 = vsel %vm554_vm2, %v1084_v24, 0 }
 0x4e3   : > { %v835_v7 = vmul.f32 %v3300_v5, %v3284_v28  ;;  %v820_v8 = vpop.xlane.xlu0 %819 }
 0x4e4   : > { %3305 = vrcp.f32 %v820_v8 }
 0x4e5   : > { %v841_v9 = vpack.c.bf16 %v835_v7, %v834_v6  ;;  %v1030_v26 = vpop.permute.xlu1 %1029 }
 0x4e6   : > { %v3302_v11 = vpop.eup %3301 }
 0x4e7   : > { %3012 = vmatmul.mubr.msk.bf16.vlgmr.msra.gmra.mrb[20].mxu1 %vm554_vm2, %v841_v9  ;;  %v836_v15 = vmul.f32 %v3302_v11, %v3286_v46  ;;  %v1032_v17 = vpop.permute.xlu0 %1031 }
 0x4e8   : > { %v3304_v13 = vpop.eup %3303  ;;  %3022 = vmatpush3.bf16.msra.mxu1 %v3776_v23  ;;  %3023 = vmatprep.mubr.msk.bf16.mxu1 %vm3508_vm1, %v3507_v49  ;;  %v1037_v22 = vsel %vm554_vm2, %v1032_v17, 0 }
 0x4e9   : > { %v837_v16 = vmul.f32 %v3304_v13, %v3288_v50  ;;  %3033 = vmatprep.subr.bf16.mxu1 %v3507_v49 }
 0x4eb   : > { %v842_v18 = vpack.c.bf16 %v837_v16, %v836_v15  ;;  %v1082_v20 = vpop.permute.xlu0 %1081 }
 0x4ed   : > { %3018 = vmatmul.mubr.msk.bf16.vlgmr.msra.gmra.mrb[16].mxu0 %vm554_vm2, %v842_v18 }
 0x4ee   : > { %3028 = vmatpush3.bf16.xpose.msra.mxu0 %v1037_v22  ;;  %3029 = vmatprep.mubr.msk.bf16.mxu0 %vm3508_vm1, %v3507_v49  ;;  %v3306_v35 = vpop.eup %3305 }
 0x4ef   : > { %3039 = vmatprep.subr.bf16.mxu0 %v3507_v49  ;;  %v838_v37 = vmul.f32 %v3306_v35, %v3830_v21  ;;  %v1134_v40 = vpop.permute.xlu0 %1133 }
 0x4f5   : > { %3030 = vmatmul.mubr.msk.bf16.vlgmr.msra.gmra.mrb[20].mxu0 %vm554_vm2, %v1030_v26 }
 0x4f6   : > { %3041 = vmatprep.mubr.msk.bf16.mxu0 %vm3508_vm1, %v3507_v49 }
 0x516   : > { %v823_v27 = vpop.xlane.xlu1 %822 }
 0x517   : > { %3307 = vrcp.f32 %v823_v27 }
 0x51a   : > { %v1136_v30 = vpop.permute.xlu1 %1135 }
 0x51b   : > { %v1141_v31 = vsel %vm554_vm2, %v1136_v30, 0 }
 0x51c   : > { %3040 = vmatpush3.bf16.xpose.msra.mxu0 %v1141_v31 }
 0x51d   : > { %3051 = vmatprep.subr.bf16.mxu0 %v3507_v49 }
 0x51e   : > { %v1188_v28 = vpop.permute.xlu1 %1187 }
 0x51f   : > { %v1193_v44 = vsel %vm554_vm2, %v1188_v28, 0 }
 0x521   : > { %v3308_v36 = vpop.eup %3307 }
 0x522   : > { %v839_v41 = vmul.f32 %v3308_v36, %v3844_v55  ;;  %v1186_v45 = vpop.permute.xlu1 %1185 }
 0x523   : > { %3042 = vmatmul.mubr.msk.bf16.vlgmr.msra.gmra.mrb[24].mxu0 %vm554_vm2, %v1134_v40 }
 0x524   : > { %v843_v42 = vpack.c.bf16 %v839_v41, %v838_v37  ;;  %3053 = vmatprep.mubr.msk.bf16.mxu0 %vm3508_vm1, %v3507_v49 }
 0x526   : > { %3024 = vmatmul.mubr.msk.bf16.vlgmr.msra.gmra.mrb[24].mxu1 %vm554_vm2, %v843_v42 }
 0x527   : > { %3034 = vmatpush3.bf16.xpose.msra.mxu1 %v1089_v43  ;;  %3035 = vmatprep.mubr.msk.bf16.mxu1 %vm3508_vm1, %v3507_v49 }
 0x528   : > { %3045 = vmatprep.subr.bf16.mxu1 %v3507_v49 }
 0x52e   : > { %3036 = vmatmul.mubr.msk.bf16.vlgmr.msra.gmra.mrb[28].mxu1 %vm554_vm2, %v1082_v20 }
 0x52f   : > { %3046 = vmatpush3.bf16.xpose.msra.mxu1 %v1193_v44  ;;  %3047 = vmatprep.mubr.msk.bf16.mxu1 %vm3508_vm1, %v3507_v49 }
 0x530   : > { %3057 = vmatprep.subr.bf16.mxu1 %v3507_v49 }
 0x536   : > { %3048 = vmatmul.mubr.msk.bf16.vlgmr.msra.gmra.mrb[32].mxu1 %vm554_vm2, %v1186_v45 }
 0x537   : > { %3059 = vmatprep.mubr.msk.bf16.mxu1 %vm3508_vm1, %v3507_v49 }
 0x5b0   : > { %v881_v46 = vpop.f32.mrb[12].mxu0 }
 0x5b1   : > { %1020 = vst.msk [vmem:[#allocation2] sm:$0xff] %vm554_vm2, %v881_v46  ;;  %v3007_v47 = vpop.f32.mrb[13].mxu0 }
 0x5b2   : > { %v884_v50 = vpop.f32.mrb[14].mxu0 }
 0x5b3   : > { %1021 = vst.msk [vmem:[#allocation2 + $0x8] sm:$0xff] %vm554_vm2, %v884_v50  ;;  %v3008_v51 = vpop.f32.mrb[15].mxu0 }
 0x5ba   : > { %v925_v21 = vpop.f32.mrb[20].mxu1 }
 0x5bb   : > { %1022 = vst.msk [vmem:[#allocation2 + $0x10] sm:$0xff] %vm554_vm2, %v925_v21  ;;  %v3013_v29 = vpop.f32.mrb[21].mxu1 }
 0x5bc   : > { %v928_v52 = vpop.f32.mrb[22].mxu1 }
 0x5bd   : > { %1023 = vst.msk [vmem:[#allocation2 + $0x18] sm:$0xff] %vm554_vm2, %v928_v52  ;;  %v3014_v53 = vpop.f32.mrb[23].mxu1 }
 0x5c0   : > { %v969_v54 = vpop.f32.mrb[16].mxu0 }
 0x5c1   : > { %1024 = vst.msk [vmem:[#allocation2 + $0x20] sm:$0xff] %vm554_vm2, %v969_v54  ;;  %v3019_v55 = vpop.f32.mrb[17].mxu0 }
 0x5c2   : > { %v972_v56 = vpop.f32.mrb[18].mxu0 }
 0x5c3   : > { %1025 = vst.msk [vmem:[#allocation2 + $0x28] sm:$0xff] %vm554_vm2, %v972_v56  ;;  %v3020_v57 = vpop.f32.mrb[19].mxu0 }
 0x5c8   : > { %v1073_v58 = vpop.f32.mrb[20].mxu0 }
 0x5c9   : > { %v3031_v48 = vpop.f32.mrb[21].mxu0  ;;  %v1236_v59 = vsel %vm554_vm2, %v1073_v58, -inf }
 0x5ca   : > { %1237 = vmax.xlane.f32.xlu0 %v1236_v59  ;;  %v1076_v39 = vpop.f32.mrb[22].mxu0 }
 0x5cb   : > { %v3032_v61 = vpop.f32.mrb[23].mxu0  ;;  %v1239_v38 = vsel %vm554_vm2, %v1076_v39, -inf }
 0x5cc   : > { %1240 = vmax.xlane.f32.xlu1 %v1239_v38 }
 0x5f6   : > { %v3900_v60 = vpop.f32.mrb[24].mxu0 }
 0x5f7   : > { %v3043_v62 = vpop.f32.mrb[25].mxu0  ;;  %v1248_v24 = vsel %vm554_vm2, %v3900_v60, -inf }
 0x5f8   : > { %v1180_v63 = vpop.f32.mrb[26].mxu0 }
 0x5f9   : > { %v1013_v0 = vpop.f32.mrb[24].mxu1  ;;  %v3044_v2 = vpop.f32.mrb[27].mxu0  ;;  %v1251_v5 = vsel %vm554_vm2, %v1180_v63, -inf }
 0x5fa   : > { %1026 = vst.msk [vmem:[#allocation2 + $0x30] sm:$0xff] %vm554_vm2, %v1013_v0  ;;  %1252 = vmax.xlane.f32.xlu1 %v1251_v5  ;;  %v3025_v6 = vpop.f32.mrb[25].mxu1 }
 0x5fb   : > { %v1016_v7 = vpop.f32.mrb[26].mxu1 }
 0x5fc   : > { %1027 = vst.msk [vmem:[#allocation2 + $0x38] sm:$0xff] %vm554_vm2, %v1016_v7  ;;  %v3026_v8 = vpop.f32.mrb[27].mxu1 }
 0x601   : > { %v1125_v9 = vpop.f32.mrb[28].mxu1 }
 0x602   : > { %v3037_v11 = vpop.f32.mrb[29].mxu1  ;;  %v1242_v13 = vsel %vm554_vm2, %v1125_v9, -inf }
 0x603   : > { %1243 = vmax.xlane.f32.xlu0 %v1242_v13  ;;  %v1128_v15 = vpop.f32.mrb[30].mxu1 }
 0x604   : > { %v3038_v16 = vpop.f32.mrb[31].mxu1  ;;  %v1245_v17 = vsel %vm554_vm2, %v1128_v15, -inf }
 0x607   : > { %1246 = vmax.xlane.f32.xlu0 %v1245_v17 }
 0x609   : > { %v1229_v18 = vpop.f32.mrb[32].mxu1 }
 0x60a   : > { %v3049_v22 = vpop.f32.mrb[33].mxu1  ;;  %v1254_v30 = vsel %vm554_vm2, %v1229_v18, -inf }
 0x60b   : > { %1377 = vrot.lane.b32.xlu1 %v3768_v12, %s3511_s16  ;;  %1249 = vmax.xlane.f32.xlu0 %v1248_v24  ;;  %v3911_v26 = vpop.f32.mrb[34].mxu1 }
 0x60c   : > { %v3050_v27 = vpop.f32.mrb[35].mxu1  ;;  %v1257_v31 = vsel %vm554_vm2, %v3911_v26, -inf }
 0x60f   : > { %1425 = vrot.lane.b32.xlu1 %v3782_v33, %s3511_s16  ;;  %1255 = vmax.xlane.f32.xlu0 %v1254_v30 }
 0x625   : > { %1329 = vrot.lane.b32.xlu0 %v3758_v3, %s3511_s16 }
 0x633   : > { %1258 = vmax.xlane.f32.xlu1 %v1257_v31 }
 0x644   : > { %1473 = vrot.lane.b32.xlu1 %v3776_v23, %s3511_s16 }
 0x657   : > { %v1238_v20 = vpop.xlane.xlu0 %1237 }
 0x658   : > { %v1260_v35 = vsub.f32 %v1073_v58, %v1238_v20 }
 0x659   : > { %v1241_v36 = vpop.xlane.xlu1 %1240 }
 0x65a   : > { %v1268_v37 = vmul.f32 1.442695, %v1260_v35  ;;  %v1261_v40 = vsub.f32 %v1076_v39, %v1241_v36 }
 0x65c   : > { %3309 = vpow2.f32 %v1268_v37  ;;  %v1270_v41 = vmul.f32 1.442695, %v1261_v40 }
 0x65e   : > { %3311 = vpow2.f32 %v1270_v41 }
 0x666   : > { %v3922_v42 = vpop.eup %3309 }
 0x667   : > { %v1284_v43 = vsel %vm554_vm2, %v3922_v42, 0.0 }
 0x668   : > { %v3926_v28 = vpop.eup %3311  ;;  %1285 = vadd.xlane.f32.xlu0 %v1284_v43 }
 0x669   : > { %v1287_v44 = vsel %vm554_vm2, %v3926_v28, 0.0 }
 0x66a   : > { %1288 = vadd.xlane.f32.xlu1 %v1287_v44 }
 0x687   : > { %v1253_v45 = vpop.xlane.xlu1 %1252 }
 0x688   : > { %v1265_v51 = vsub.f32 %v1180_v63, %v1253_v45 }
 0x68a   : > { %v1278_v53 = vmul.f32 1.442695, %v1265_v51 }
 0x68b   : > { %v1378_v46 = vpop.permute.xlu1 %1377 }
 0x68c   : > { %3058 = vmatpush3.bf16.msra.mxu1 %v1378_v46 }
 0x68d   : > { %3069 = vmatprep.subr.bf16.mxu1 %v3507_v49 }
 0x68f   : > { %v1426_v8 = vpop.permute.xlu1 %1425 }
 0x690   : > { %v1244_v47 = vpop.xlane.xlu0 %1243 }
 0x691   : > { %v1262_v50 = vsub.f32 %v1125_v9, %v1244_v47 }
 0x693   : > { %v1272_v21 = vmul.f32 1.442695, %v1262_v50 }
 0x694   : > { %v1247_v29 = vpop.xlane.xlu0 %1246 }
 0x695   : > { %3313 = vpow2.f32 %v1272_v21  ;;  %v1263_v52 = vsub.f32 %v1128_v15, %v1247_v29 }
 0x697   : > { %v1274_v54 = vmul.f32 1.442695, %v1263_v52 }
 0x698   : > { %v1250_v55 = vpop.xlane.xlu0 %1249 }
 0x699   : > { %3315 = vpow2.f32 %v1274_v54  ;;  %v1264_v56 = vsub.f32 %v3900_v60, %v1250_v55 }
 0x69a   : > { %3317 = vpow2.f32 %v1278_v53 }
 0x69b   : > { %v1276_v57 = vmul.f32 1.442695, %v1264_v56 }
 0x69c   : > { %v1256_v58 = vpop.xlane.xlu0 %1255 }
 0x69d   : > { %3319 = vpow2.f32 %v1276_v57  ;;  %v1266_v48 = vsub.f32 %v1229_v18, %v1256_v58 }
 0x69f   : > { %v3314_v59 = vpop.eup %3313  ;;  %v1280_v39 = vmul.f32 1.442695, %v1266_v48 }
 0x6a0   : > { %v1330_v61 = vpop.permute.xlu0 %1329  ;;  %v1290_v38 = vsel %vm554_vm2, %v3314_v59, 0.0 }
 0x6a1   : > { %3321 = vpow2.f32 %v1280_v39  ;;  %1291 = vadd.xlane.f32.xlu0 %v1290_v38  ;;  %3052 = vmatpush3.bf16.msra.mxu0 %v1330_v61 }
 0x6a2   : > { %3063 = vmatprep.subr.bf16.mxu0 %v3507_v49 }
 0x6a3   : > { %v3316_v62 = vpop.eup %3315 }
 0x6a4   : > { %v1293_v63 = vsel %vm554_vm2, %v3316_v62, 0.0  ;;  %v3318_v0 = vpop.eup %3317 }
 0x6a5   : > { %1294 = vadd.xlane.f32.xlu1 %v1293_v63  ;;  %v1299_v5 = vsel %vm554_vm2, %v3318_v0, 0.0 }
 0x6a7   : > { %v3320_v60 = vpop.eup %3319 }
 0x6a8   : > { %v1296_v2 = vsel %vm554_vm2, %v3320_v60, 0.0 }
 0x6a9   : > { %1297 = vadd.xlane.f32.xlu0 %v1296_v2  ;;  %1300 = vadd.xlane.f32.xlu1 %v1299_v5 }
 0x6ab   : > { %v3937_v6 = vpop.eup %3321 }
 0x6ac   : > { %v1302_v7 = vsel %vm554_vm2, %v3937_v6, 0.0 }
 0x6ad   : > { %1303 = vadd.xlane.f32.xlu0 %v1302_v7 }
 0x6ba   : > { %1614 = vrot.lane.b32.xlu1 %v3766_v10, %s3512_s18 }
 0x6c0   : > { %v1259_v9 = vpop.xlane.xlu1 %1258 }
 0x6c1   : > { %v1267_v11 = vsub.f32 %v3911_v26, %v1259_v9 }
 0x6c3   : > { %1563 = vrot.lane.b32.xlu0 %v3756_v1, %s3512_s18  ;;  %v1282_v13 = vmul.f32 1.442695, %v1267_v11 }
 0x6c4   : > { %v1474_v17 = vpop.permute.xlu1 %1473 }
 0x6c5   : > { %3323 = vpow2.f32 %v1282_v13 }
 0x6c7   : > { %1561 = vrot.lane.b32.xlu0 %v3760_v4, %s3513_s19 }
 0x6cb   : > { %1612 = vrot.lane.b32.xlu0 %v3770_v14, %s3513_s19 }
 0x6cf   : > { %1663 = vrot.lane.b32.xlu0 %v3784_v34, %s3513_s19  ;;  %v3952_v15 = vpop.eup %3323 }
 0x6d0   : > { %v1305_v16 = vsel %vm554_vm2, %v3952_v15, 0.0 }
 0x6de   : > { %1306 = vadd.xlane.f32.xlu1 %v1305_v16 }
 0x6ef   : > { %1665 = vrot.lane.b32.xlu1 %v3780_v32, %s3512_s18 }
 0x6f3   : > { %1716 = vrot.lane.b32.xlu1 %v3774_v19, %s3512_s18 }
 0x6f5   : > { %v1286_v18 = vpop.xlane.xlu0 %1285 }
 0x6f6   : > { %3325 = vrcp.f32 %v1286_v18 }
 0x6f7   : > { %1714 = vrot.lane.b32.xlu1 %v3778_v25, %s3513_s19  ;;  %v1289_v22 = vpop.xlane.xlu1 %1288 }
 0x6f8   : > { %3327 = vrcp.f32 %v1289_v22 }
 0x700   : > { %v3326_v24 = vpop.eup %3325 }
 0x701   : > { %v1316_v27 = vmul.f32 %v3326_v24, %v3922_v42 }
 0x702   : > { %v3328_v26 = vpop.eup %3327 }
 0x703   : > { %v1317_v30 = vmul.f32 %v3328_v26, %v3926_v28 }
 0x705   : > { %v1324_v31 = vpack.c.bf16 %v1317_v30, %v1316_v27 }
 0x707   : > { %3054 = vmatmul.mubr.msk.bf16.vlgmr.msra.gmra.mrb[28].mxu0 %vm554_vm2, %v1324_v31 }
 0x708   : > { %3064 = vmatpush3.bf16.msra.mxu0 %v1426_v8  ;;  %3065 = vmatprep.mubr.msk.bf16.mxu0 %vm3508_vm1, %v3507_v49 }
 0x709   : > { %3075 = vmatprep.subr.bf16.mxu0 %v3507_v49 }
 0x72e   : > { %v1292_v20 = vpop.xlane.xlu0 %1291 }
 0x72f   : > { %3329 = vrcp.f32 %v1292_v20 }
 0x732   : > { %v1295_v35 = vpop.xlane.xlu1 %1294 }
 0x733   : > { %3331 = vrcp.f32 %v1295_v35 }
 0x736   : > { %v1298_v36 = vpop.xlane.xlu0 %1297  ;;  %v1301_v37 = vpop.xlane.xlu1 %1300 }
 0x737   : > { %3333 = vrcp.f32 %v1298_v36 }
 0x738   : > { %3335 = vrcp.f32 %v1301_v37 }
 0x739   : > { %v3330_v40 = vpop.eup %3329 }
 0x73a   : > { %v1318_v42 = vmul.f32 %v3330_v40, %v3314_v59  ;;  %v1304_v28 = vpop.xlane.xlu0 %1303  ;;  %v1615_v53 = vpop.permute.xlu1 %1614 }
 0x73b   : > { %3337 = vrcp.f32 %v1304_v28 }
 0x73d   : > { %v3332_v41 = vpop.eup %3331 }
 0x73e   : > { %v1319_v43 = vmul.f32 %v3332_v41, %v3316_v62  ;;  %v1564_v51 = vpop.permute.xlu0 %1563  ;;  %v1620_v62 = vsel %vm554_vm2, %v1615_v53, 0 }
 0x73f   : > { %v1569_v29 = vsel %vm554_vm2, %v1564_v51, 0 }
 0x740   : > { %v1325_v44 = vpack.c.bf16 %v1319_v43, %v1318_v42 }
 0x741   : > { %v3334_v45 = vpop.eup %3333 }
 0x742   : > { %v3336_v46 = vpop.eup %3335  ;;  %v1320_v47 = vmul.f32 %v3334_v45, %v3320_v60  ;;  %3060 = vmatmul.mubr.msk.bf16.vlgmr.msra.gmra.mrb[36].mxu1 %vm554_vm2, %v1325_v44  ;;  %v1562_v52 = vpop.permute.xlu0 %1561 }
 0x743   : > { %v1321_v50 = vmul.f32 %v3336_v46, %v3318_v0  ;;  %3070 = vmatpush3.bf16.msra.mxu1 %v1474_v17  ;;  %3071 = vmatprep.mubr.msk.bf16.mxu1 %vm3508_vm1, %v3507_v49 }
 0x744   : > { %3081 = vmatprep.subr.bf16.mxu1 %v3507_v49 }
 0x745   : > { %v1326_v21 = vpack.c.bf16 %v1321_v50, %v1320_v47  ;;  %v3338_v58 = vpop.eup %3337 }
 0x746   : > { %v1613_v57 = vpop.permute.xlu0 %1612  ;;  %v1322_v59 = vmul.f32 %v3338_v58, %v3937_v6 }
 0x747   : > { %3066 = vmatmul.mubr.msk.bf16.vlgmr.msra.gmra.mrb[32].mxu0 %vm554_vm2, %v1326_v21 }
 0x748   : > { %3076 = vmatpush3.bf16.xpose.msra.mxu0 %v1569_v29  ;;  %3077 = vmatprep.mubr.msk.bf16.mxu0 %vm3508_vm1, %v3507_v49 }
 0x749   : > { %3087 = vmatprep.subr.bf16.mxu0 %v3507_v49 }
 0x74a   : > { %v1664_v39 = vpop.permute.xlu0 %1663 }
 0x74f   : > { %3078 = vmatmul.mubr.msk.bf16.vlgmr.msra.gmra.mrb[36].mxu0 %vm554_vm2, %v1562_v52 }
 0x750   : > { %3089 = vmatprep.mubr.msk.bf16.mxu0 %vm3508_vm1, %v3507_v49 }
 0x76b   : > { %v1307_v54 = vpop.xlane.xlu1 %1306 }
 0x76c   : > { %3339 = vrcp.f32 %v1307_v54 }
 0x76f   : > { %v1666_v55 = vpop.permute.xlu1 %1665 }
 0x770   : > { %v1671_v56 = vsel %vm554_vm2, %v1666_v55, 0 }
 0x771   : > { %3088 = vmatpush3.bf16.xpose.msra.mxu0 %v1671_v56 }
 0x772   : > { %3099 = vmatprep.subr.bf16.mxu0 %v3507_v49 }
 0x773   : > { %v1717_v63 = vpop.permute.xlu1 %1716 }
 0x774   : > { %v1722_v0 = vsel %vm554_vm2, %v1717_v63, 0 }
 0x776   : > { %v3340_v48 = vpop.eup %3339 }
 0x777   : > { %v1323_v61 = vmul.f32 %v3340_v48, %v3952_v15  ;;  %v1715_v60 = vpop.permute.xlu1 %1714 }
 0x778   : > { %3090 = vmatmul.mubr.msk.bf16.vlgmr.msra.gmra.mrb[40].mxu0 %vm554_vm2, %v1664_v39 }
 0x779   : > { %v1327_v38 = vpack.c.bf16 %v1323_v61, %v1322_v59  ;;  %3101 = vmatprep.mubr.msk.bf16.mxu0 %vm3508_vm1, %v3507_v49 }
 0x77b   : > { %3072 = vmatmul.mubr.msk.bf16.vlgmr.msra.gmra.mrb[40].mxu1 %vm554_vm2, %v1327_v38 }
 0x77c   : > { %3082 = vmatpush3.bf16.xpose.msra.mxu1 %v1620_v62  ;;  %3083 = vmatprep.mubr.msk.bf16.mxu1 %vm3508_vm1, %v3507_v49 }
 0x77d   : > { %3093 = vmatprep.subr.bf16.mxu1 %v3507_v49 }
 0x783   : > { %3084 = vmatmul.mubr.msk.bf16.vlgmr.msra.gmra.mrb[44].mxu1 %vm554_vm2, %v1613_v57 }
 0x784   : > { %3094 = vmatpush3.bf16.xpose.msra.mxu1 %v1722_v0  ;;  %3095 = vmatprep.mubr.msk.bf16.mxu1 %vm3508_vm1, %v3507_v49 }
 0x785   : > { %3105 = vmatprep.subr.bf16.mxu1 %v3507_v49 }
 0x78b   : > { %3096 = vmatmul.mubr.msk.bf16.vlgmr.msra.gmra.mrb[48].mxu1 %vm554_vm2, %v1715_v60 }
 0x78c   : > { %3107 = vmatprep.mubr.msk.bf16.mxu1 %vm3508_vm1, %v3507_v49 }
 0x7da   : > { %v4000_v2 = vpop.f32.mrb[28].mxu0 }
 0x7db   : > { %v3055_v5 = vpop.f32.mrb[29].mxu0 }
 0x7dc   : > { %v4002_v6 = vpop.f32.mrb[30].mxu0 }
 0x7dd   : > { %v3056_v7 = vpop.f32.mrb[31].mxu0 }
 0x815   : > { %v4004_v8 = vpop.f32.mrb[36].mxu1 }
 0x816   : > { %v3061_v9 = vpop.f32.mrb[37].mxu1 }
 0x817   : > { %v4006_v11 = vpop.f32.mrb[38].mxu1 }
 0x818   : > { %v3062_v13 = vpop.f32.mrb[39].mxu1 }
 0x81a   : > { %v4008_v15 = vpop.f32.mrb[32].mxu0 }
 0x81b   : > { %v3067_v16 = vpop.f32.mrb[33].mxu0 }
 0x81c   : > { %v4010_v17 = vpop.f32.mrb[34].mxu0 }
 0x81d   : > { %v3068_v18 = vpop.f32.mrb[35].mxu0 }
 0x822   : > { %v1605_v22 = vpop.f32.mrb[36].mxu0 }
 0x823   : > { %v3079_v24 = vpop.f32.mrb[37].mxu0  ;;  %v1765_v26 = vsel %vm554_vm2, %v1605_v22, -inf }
 0x824   : > { %1766 = vmax.xlane.f32.xlu0 %v1765_v26  ;;  %v1608_v27 = vpop.f32.mrb[38].mxu0 }
 0x825   : > { %v3080_v30 = vpop.f32.mrb[39].mxu0  ;;  %v1768_v31 = vsel %vm554_vm2, %v1608_v27, -inf }
 0x826   : > { %1769 = vmax.xlane.f32.xlu1 %v1768_v31 }
 0x84b   : > { %v4014_v20 = vpop.f32.mrb[40].mxu0 }
 0x84c   : > { %v3091_v35 = vpop.f32.mrb[41].mxu0  ;;  %v1777_v52 = vsel %vm554_vm2, %v4014_v20, -inf }
 0x84d   : > { %v1710_v36 = vpop.f32.mrb[42].mxu0 }
 0x84e   : > { %v4016_v37 = vpop.f32.mrb[40].mxu1  ;;  %v3092_v40 = vpop.f32.mrb[43].mxu0  ;;  %v1780_v41 = vsel %vm554_vm2, %v1710_v36, -inf }
 0x84f   : > { %1781 = vmax.xlane.f32.xlu1 %v1780_v41  ;;  %v3073_v42 = vpop.f32.mrb[41].mxu1 }
 0x850   : > { %v4019_v43 = vpop.f32.mrb[42].mxu1 }
 0x851   : > { %v3074_v28 = vpop.f32.mrb[43].mxu1 }
 0x856   : > { %v1656_v44 = vpop.f32.mrb[44].mxu1 }
 0x857   : > { %v3085_v45 = vpop.f32.mrb[45].mxu1  ;;  %v1771_v46 = vsel %vm554_vm2, %v1656_v44, -inf }
 0x858   : > { %1772 = vmax.xlane.f32.xlu0 %v1771_v46  ;;  %v1659_v47 = vpop.f32.mrb[46].mxu1 }
 0x859   : > { %v3086_v50 = vpop.f32.mrb[47].mxu1  ;;  %v1774_v51 = vsel %vm554_vm2, %v1659_v47, -inf }
 0x85c   : > { %1775 = vmax.xlane.f32.xlu0 %v1774_v51 }
 0x85e   : > { %v1758_v21 = vpop.f32.mrb[48].mxu1 }
 0x85f   : > { %v3097_v29 = vpop.f32.mrb[49].mxu1  ;;  %v1783_v55 = vsel %vm554_vm2, %v1758_v21, -inf }
 0x860   : > { %1904 = vrot.lane.b32.xlu1 %v3768_v12, %s3513_s19  ;;  %1778 = vmax.xlane.f32.xlu0 %v1777_v52  ;;  %v4027_v53 = vpop.f32.mrb[50].mxu1 }
 0x861   : > { %v3098_v54 = vpop.f32.mrb[51].mxu1  ;;  %v1786_v56 = vsel %vm554_vm2, %v4027_v53, -inf }
 0x864   : > { %1951 = vrot.lane.b32.xlu1 %v3782_v33, %s3513_s19  ;;  %1784 = vmax.xlane.f32.xlu0 %v1783_v55 }
 0x87a   : > { %1857 = vrot.lane.b32.xlu0 %v3758_v3, %s3513_s19 }
 0x888   : > { %1787 = vmax.xlane.f32.xlu1 %v1786_v56 }
 0x899   : > { %1998 = vrot.lane.b32.xlu1 %v3776_v23, %s3513_s19  ;;  %s270_s19 = scalar_lea.vmem [#allocation6], %s2844_s7 }
 0x8b1   : > { %v1767_v57 = vpop.xlane.xlu0 %1766 }
 0x8b2   : > { %v1789_v58 = vsub.f32 %v1605_v22, %v1767_v57 }
 0x8b3   : > { %v1770_v48 = vpop.xlane.xlu1 %1769 }
 0x8b4   : > { %v1797_v59 = vmul.f32 1.442695, %v1789_v58  ;;  %v1790_v39 = vsub.f32 %v1608_v27, %v1770_v48 }
 0x8b6   : > { %3341 = vpow2.f32 %v1797_v59  ;;  %v1799_v61 = vmul.f32 1.442695, %v1790_v39 }
 0x8b8   : > { %3343 = vpow2.f32 %v1799_v61 }
 0x8c0   : > { %v4038_v38 = vpop.eup %3341 }
 0x8c1   : > { %v1813_v62 = vsel %vm554_vm2, %v4038_v38, 0.0 }
 0x8c2   : > { %v4042_v63 = vpop.eup %3343  ;;  %1814 = vadd.xlane.f32.xlu0 %v1813_v62 }
 0x8c3   : > { %v1816_v0 = vsel %vm554_vm2, %v4042_v63, 0.0 }
 0x8c4   : > { %1817 = vadd.xlane.f32.xlu1 %v1816_v0 }
 0x8dc   : > { %v1782_v60 = vpop.xlane.xlu1 %1781 }
 0x8dd   : > { %v1794_v13 = vsub.f32 %v1710_v36, %v1782_v60 }
 0x8df   : > { %v1807_v24 = vmul.f32 1.442695, %v1794_v13 }
 0x8e0   : > { %v1905_v5 = vpop.permute.xlu1 %1904 }
 0x8e1   : > { %3106 = vmatpush3.bf16.msra.mxu1 %v1905_v5 }
 0x8e2   : > { %3117 = vmatprep.subr.bf16.mxu1 %v3507_v49 }
 0x8e4   : > { %v1952_v29 = vpop.permute.xlu1 %1951 }
 0x8e5   : > { %v1773_v7 = vpop.xlane.xlu0 %1772 }
 0x8e6   : > { %v1791_v9 = vsub.f32 %v1656_v44, %v1773_v7 }
 0x8e8   : > { %v1801_v16 = vmul.f32 1.442695, %v1791_v9 }
 0x8e9   : > { %v1776_v18 = vpop.xlane.xlu0 %1775 }
 0x8ea   : > { %3345 = vpow2.f32 %v1801_v16  ;;  %v1792_v22 = vsub.f32 %v1659_v47, %v1776_v18 }
 0x8ec   : > { %v1803_v26 = vmul.f32 1.442695, %v1792_v22 }
 0x8ed   : > { %v1779_v27 = vpop.xlane.xlu0 %1778 }
 0x8ee   : > { %3347 = vpow2.f32 %v1803_v26  ;;  %v1793_v30 = vsub.f32 %v4014_v20, %v1779_v27 }
 0x8ef   : > { %3349 = vpow2.f32 %v1807_v24 }
 0x8f0   : > { %v1805_v31 = vmul.f32 1.442695, %v1793_v30 }
 0x8f1   : > { %v1785_v35 = vpop.xlane.xlu0 %1784 }
 0x8f2   : > { %3351 = vpow2.f32 %v1805_v31  ;;  %v1795_v40 = vsub.f32 %v1758_v21, %v1785_v35 }
 0x8f4   : > { %v3346_v41 = vpop.eup %3345  ;;  %v1809_v42 = vmul.f32 1.442695, %v1795_v40 }
 0x8f5   : > { %v1858_v28 = vpop.permute.xlu0 %1857  ;;  %v1819_v36 = vsel %vm554_vm2, %v3346_v41, 0.0 }
 0x8f6   : > { %3353 = vpow2.f32 %v1809_v42  ;;  %1820 = vadd.xlane.f32.xlu0 %v1819_v36  ;;  %3100 = vmatpush3.bf16.msra.mxu0 %v1858_v28 }
 0x8f7   : > { %3111 = vmatprep.subr.bf16.mxu0 %v3507_v49 }
 0x8f8   : > { %v3348_v44 = vpop.eup %3347 }
 0x8f9   : > { %v1822_v45 = vsel %vm554_vm2, %v3348_v44, 0.0  ;;  %v3350_v46 = vpop.eup %3349 }
 0x8fa   : > { %1823 = vadd.xlane.f32.xlu1 %v1822_v45  ;;  %v1828_v50 = vsel %vm554_vm2, %v3350_v46, 0.0 }
 0x8fc   : > { %v3352_v20 = vpop.eup %3351 }
 0x8fd   : > { %v1825_v47 = vsel %vm554_vm2, %v3352_v20, 0.0 }
 0x8fe   : > { %1826 = vadd.xlane.f32.xlu0 %v1825_v47  ;;  %1829 = vadd.xlane.f32.xlu1 %v1828_v50 }
 0x900   : > { %v4053_v51 = vpop.eup %3353 }
 0x901   : > { %v1831_v21 = vsel %vm554_vm2, %v4053_v51, 0.0 }
 0x902   : > { %1832 = vadd.xlane.f32.xlu0 %v1831_v21 }
 0x90f   : > { %2139 = vrot.lane.b32.xlu1 %v3766_v10, %s3514_s20 }
 0x915   : > { %v1788_v52 = vpop.xlane.xlu1 %1787 }
 0x916   : > { %v1796_v54 = vsub.f32 %v4027_v53, %v1788_v52 }
 0x918   : > { %2088 = vrot.lane.b32.xlu0 %v3756_v1, %s3514_s20  ;;  %v1811_v55 = vmul.f32 1.442695, %v1796_v54 }
 0x91a   : > { %3355 = vpow2.f32 %v1811_v55 }
 0x91c   : > { %2086 = vrot.lane.b32.xlu0 %v3760_v4, %s3515_s11  ;;  %v1999_v4 = vpop.permute.xlu1 %1998 }
 0x920   : > { %2137 = vrot.lane.b32.xlu0 %v3770_v14, %s3515_s11 }
 0x924   : > { %2188 = vrot.lane.b32.xlu0 %v3784_v34, %s3515_s11  ;;  %v4068_v10 = vpop.eup %3355 }
 0x925   : > { %v1834_v1 = vsel %vm554_vm2, %v4068_v10, 0.0 }
 0x933   : > { %1835 = vadd.xlane.f32.xlu1 %v1834_v1 }
 0x944   : > { %2190 = vrot.lane.b32.xlu1 %v3780_v32, %s3514_s20 }
 0x948   : > { %2241 = vrot.lane.b32.xlu1 %v3774_v19, %s3514_s20 }
 0x94c   : > { %2239 = vrot.lane.b32.xlu1 %v3778_v25, %s3515_s11 }
 0x94f   : > { %v1815_v14 = vpop.xlane.xlu0 %1814 }
 0x950   : > { %3357 = vrcp.f32 %v1815_v14 }
 0x951   : > { %v1818_v34 = vpop.xlane.xlu1 %1817 }
 0x952   : > { %3359 = vrcp.f32 %v1818_v34 }
 0x95a   : > { %v3358_v53 = vpop.eup %3357 }
 0x95b   : > { %v1845_v57 = vmul.f32 %v3358_v53, %v4038_v38 }
 0x95c   : > { %v3360_v56 = vpop.eup %3359 }
 0x95d   : > { %v1846_v58 = vmul.f32 %v3360_v56, %v4042_v63 }
 0x95f   : > { %v1853_v48 = vpack.c.bf16 %v1846_v58, %v1845_v57 }
 0x961   : > { %3102 = vmatmul.mubr.msk.bf16.vlgmr.msra.gmra.mrb[44].mxu0 %vm554_vm2, %v1853_v48 }
 0x962   : > { %3112 = vmatpush3.bf16.msra.mxu0 %v1952_v29  ;;  %3113 = vmatprep.mubr.msk.bf16.mxu0 %vm3508_vm1, %v3507_v49 }
 0x963   : > { %3123 = vmatprep.subr.bf16.mxu0 %v3507_v49 }
 0x983   : > { %v1821_v19 = vpop.xlane.xlu0 %1820 }
 0x984   : > { %3361 = vrcp.f32 %v1821_v19 }
 0x987   : > { %v1824_v25 = vpop.xlane.xlu1 %1823 }
 0x988   : > { %3363 = vrcp.f32 %v1824_v25 }
 0x98b   : > { %v1827_v32 = vpop.xlane.xlu0 %1826  ;;  %v1830_v59 = vpop.xlane.xlu1 %1829 }
 0x98c   : > { %3365 = vrcp.f32 %v1827_v32 }
 0x98d   : > { %3367 = vrcp.f32 %v1830_v59 }
 0x98e   : > { %v3362_v39 = vpop.eup %3361 }
 0x98f   : > { %v1847_v38 = vmul.f32 %v3362_v39, %v3346_v41  ;;  %v1833_v63 = vpop.xlane.xlu0 %1832  ;;  %v2140_v24 = vpop.permute.xlu1 %2139 }
 0x990   : > { %3369 = vrcp.f32 %v1833_v63 }
 0x992   : > { %v3364_v61 = vpop.eup %3363 }
 0x993   : > { %v1848_v62 = vmul.f32 %v3364_v61, %v3348_v44  ;;  %v2089_v13 = vpop.permute.xlu0 %2088  ;;  %v2145_v44 = vsel %vm554_vm2, %v2140_v24, 0 }
 0x994   : > { %v2094_v18 = vsel %vm554_vm2, %v2089_v13, 0 }
 0x995   : > { %v1854_v0 = vpack.c.bf16 %v1848_v62, %v1847_v38 }
 0x996   : > { %v3366_v60 = vpop.eup %3365 }
 0x997   : > { %v3368_v5 = vpop.eup %3367  ;;  %v1849_v7 = vmul.f32 %v3366_v60, %v3352_v20  ;;  %3108 = vmatmul.mubr.msk.bf16.vlgmr.msra.gmra.mrb[52].mxu1 %vm554_vm2, %v1854_v0  ;;  %v2087_v22 = vpop.permute.xlu0 %2086 }
 0x998   : > { %v1850_v9 = vmul.f32 %v3368_v5, %v3350_v46  ;;  %3118 = vmatpush3.bf16.msra.mxu1 %v1999_v4  ;;  %3119 = vmatprep.mubr.msk.bf16.mxu1 %vm3508_vm1, %v3507_v49 }
 0x999   : > { %3129 = vmatprep.subr.bf16.mxu1 %v3507_v49 }
 0x99a   : > { %v1855_v16 = vpack.c.bf16 %v1850_v9, %v1849_v7  ;;  %v3370_v35 = vpop.eup %3369 }
 0x99b   : > { %v2138_v31 = vpop.permute.xlu0 %2137  ;;  %v1851_v41 = vmul.f32 %v3370_v35, %v4053_v51 }
 0x99c   : > { %3114 = vmatmul.mubr.msk.bf16.vlgmr.msra.gmra.mrb[48].mxu0 %vm554_vm2, %v1855_v16 }
 0x99d   : > { %3124 = vmatpush3.bf16.xpose.msra.mxu0 %v2094_v18  ;;  %3125 = vmatprep.mubr.msk.bf16.mxu0 %vm3508_vm1, %v3507_v49 }
 0x99e   : > { %3135 = vmatprep.subr.bf16.mxu0 %v3507_v49 }
 0x99f   : > { %v2189_v42 = vpop.permute.xlu0 %2188 }
 0x9a4   : > { %3126 = vmatmul.mubr.msk.bf16.vlgmr.msra.gmra.mrb[52].mxu0 %vm554_vm2, %v2087_v22 }
 0x9a5   : > { %3137 = vmatprep.mubr.msk.bf16.mxu0 %vm3508_vm1, %v3507_v49 }
 0x9c0   : > { %v1836_v26 = vpop.xlane.xlu1 %1835 }
 0x9c1   : > { %3371 = vrcp.f32 %v1836_v26 }
 0x9c4   : > { %v2191_v27 = vpop.permute.xlu1 %2190 }
 0x9c5   : > { %v2196_v30 = vsel %vm554_vm2, %v2191_v27, 0 }
 0x9c6   : > { %3136 = vmatpush3.bf16.xpose.msra.mxu0 %v2196_v30 }
 0x9c7   : > { %3147 = vmatprep.subr.bf16.mxu0 %v3507_v49 }
 0x9c8   : > { %v2242_v45 = vpop.permute.xlu1 %2241 }
 0x9c9   : > { %v2247_v46 = vsel %vm554_vm2, %v2242_v45, 0 }
 0x9cb   : > { %v3372_v40 = vpop.eup %3371 }
 0x9cc   : > { %v1852_v28 = vmul.f32 %v3372_v40, %v4068_v10  ;;  %v2240_v20 = vpop.permute.xlu1 %2239 }
 0x9cd   : > { %3138 = vmatmul.mubr.msk.bf16.vlgmr.msra.gmra.mrb[56].mxu0 %vm554_vm2, %v2189_v42 }
 0x9ce   : > { %v1856_v36 = vpack.c.bf16 %v1852_v28, %v1851_v41  ;;  %3149 = vmatprep.mubr.msk.bf16.mxu0 %vm3508_vm1, %v3507_v49 }
 0x9d0   : > { %3120 = vmatmul.mubr.msk.bf16.vlgmr.msra.gmra.mrb[56].mxu1 %vm554_vm2, %v1856_v36 }
 0x9d1   : > { %3130 = vmatpush3.bf16.xpose.msra.mxu1 %v2145_v44  ;;  %3131 = vmatprep.mubr.msk.bf16.mxu1 %vm3508_vm1, %v3507_v49 }
 0x9d2   : > { %3141 = vmatprep.subr.bf16.mxu1 %v3507_v49 }
 0x9d8   : > { %3132 = vmatmul.mubr.msk.bf16.vlgmr.msra.gmra.mrb[60].mxu1 %vm554_vm2, %v2138_v31 }
 0x9d9   : > { %3142 = vmatpush3.bf16.xpose.msra.mxu1 %v2247_v46  ;;  %3143 = vmatprep.mubr.msk.bf16.mxu1 %vm3508_vm1, %v3507_v49 }
 0x9da   : > { %3153 = vmatprep.subr.bf16.mxu1 %v3507_v49 }
 0x9e0   : > { %3144 = vmatmul.mubr.msk.bf16.vlgmr.msra.gmra.mrb[64].mxu1 %vm554_vm2, %v2240_v20 }
 0x9e1   : > { %3155 = vmatprep.mubr.msk.bf16.mxu1 %vm3508_vm1, %v3507_v49 }
 0xa34   : > { %v4116_v47 = vpop.f32.mrb[44].mxu0 }
 0xa35   : > { %v3103_v50 = vpop.f32.mrb[45].mxu0 }
 0xa36   : > { %v4118_v51 = vpop.f32.mrb[46].mxu0 }
 0xa37   : > { %v3104_v21 = vpop.f32.mrb[47].mxu0 }
 0xa6a   : > { %v4120_v29 = vpop.f32.mrb[52].mxu1 }
 0xa6b   : > { %v3109_v52 = vpop.f32.mrb[53].mxu1 }
 0xa6c   : > { %v4122_v54 = vpop.f32.mrb[54].mxu1 }
 0xa6d   : > { %v3110_v55 = vpop.f32.mrb[55].mxu1 }
 0xa6f   : > { %v4124_v10 = vpop.f32.mrb[48].mxu0 }
 0xa70   : > { %v3115_v1 = vpop.f32.mrb[49].mxu0 }
 0xa71   : > { %v4126_v4 = vpop.f32.mrb[50].mxu0 }
 0xa72   : > { %v3116_v14 = vpop.f32.mrb[51].mxu0 }
 0xa77   : > { %v2130_v34 = vpop.f32.mrb[52].mxu0 }
 0xa78   : > { %v3127_v53 = vpop.f32.mrb[53].mxu0  ;;  %v2290_v56 = vsel %vm554_vm2, %v2130_v34, -inf }
 0xa79   : > { %2291 = vmax.xlane.f32.xlu0 %v2290_v56  ;;  %v2133_v57 = vpop.f32.mrb[54].mxu0 }
 0xa7a   : > { %v3128_v58 = vpop.f32.mrb[55].mxu0  ;;  %v2293_v48 = vsel %vm554_vm2, %v2133_v57, -inf }
 0xa7b   : > { %2294 = vmax.xlane.f32.xlu1 %v2293_v48 }
 0xaa0   : > { %v2232_v19 = vpop.f32.mrb[56].mxu0 }
 0xaa1   : > { %v3139_v25 = vpop.f32.mrb[57].mxu0  ;;  %v2302_v22 = vsel %vm554_vm2, %v2232_v19, -inf }
 0xaa2   : > { %v2235_v32 = vpop.f32.mrb[58].mxu0 }
 0xaa3   : > { %v4130_v59 = vpop.f32.mrb[56].mxu1  ;;  %v3140_v39 = vpop.f32.mrb[59].mxu0  ;;  %v2305_v61 = vsel %vm554_vm2, %v2235_v32, -inf }
 0xaa4   : > { %2306 = vmax.xlane.f32.xlu1 %v2305_v61  ;;  %v3121_v38 = vpop.f32.mrb[57].mxu1 }
 0xaa5   : > { %v4133_v62 = vpop.f32.mrb[58].mxu1 }
 0xaa6   : > { %v3122_v63 = vpop.f32.mrb[59].mxu1 }
 0xaab   : > { %v2181_v0 = vpop.f32.mrb[60].mxu1 }
 0xaac   : > { %v3133_v60 = vpop.f32.mrb[61].mxu1  ;;  %v2296_v5 = vsel %vm554_vm2, %v2181_v0, -inf }
 0xaad   : > { %2297 = vmax.xlane.f32.xlu0 %v2296_v5  ;;  %v2184_v7 = vpop.f32.mrb[62].mxu1 }
 0xaae   : > { %v3134_v9 = vpop.f32.mrb[63].mxu1  ;;  %v2299_v13 = vsel %vm554_vm2, %v2184_v7, -inf }
 0xab1   : > { %2300 = vmax.xlane.f32.xlu0 %v2299_v13 }
 0xab3   : > { %v2283_v16 = vpop.f32.mrb[64].mxu1 }
 0xab4   : > { %v3145_v18 = vpop.f32.mrb[65].mxu1  ;;  %v2308_v30 = vsel %vm554_vm2, %v2283_v16, -inf }
 0xab5   : > { %2303 = vmax.xlane.f32.xlu0 %v2302_v22  ;;  %v4138_v24 = vpop.f32.mrb[66].mxu1 }
 0xab6   : > { %v3146_v26 = vpop.f32.mrb[67].mxu1  ;;  %v2311_v27 = vsel %vm554_vm2, %v4138_v24, -inf }
 0xab7   : > { %2312 = vmax.xlane.f32.xlu1 %v2311_v27 }
 0xab9   : > { %2309 = vmax.xlane.f32.xlu0 %v2308_v30 }
 0xb06   : > { %v2292_v31 = vpop.xlane.xlu0 %2291 }
 0xb07   : > { %v2314_v35 = vsub.f32 %v2130_v34, %v2292_v31 }
 0xb08   : > { %v2295_v40 = vpop.xlane.xlu1 %2294 }
 0xb09   : > { %v2322_v41 = vmul.f32 1.442695, %v2314_v35  ;;  %v2315_v42 = vsub.f32 %v2133_v57, %v2295_v40 }
 0xb0b   : > { %3373 = vpow2.f32 %v2322_v41  ;;  %v2324_v28 = vmul.f32 1.442695, %v2315_v42 }
 0xb0d   : > { %3375 = vpow2.f32 %v2324_v28 }
 0xb15   : > { %v4143_v36 = vpop.eup %3373 }
 0xb16   : > { %v2338_v44 = vsel %vm554_vm2, %v4143_v36, 0.0 }
 0xb17   : > { %v4147_v45 = vpop.eup %3375  ;;  %2339 = vadd.xlane.f32.xlu0 %v2338_v44 }
 0xb18   : > { %v2341_v46 = vsel %vm554_vm2, %v4147_v45, 0.0 }
 0xb19   : > { %2342 = vadd.xlane.f32.xlu1 %v2341_v46 }
 0xb31   : > { %v2307_v20 = vpop.xlane.xlu1 %2306 }
 0xb32   : > { %v2319_v52 = vsub.f32 %v2235_v32, %v2307_v20 }
 0xb34   : > { %v2332_v34 = vmul.f32 1.442695, %v2319_v52 }
 0xb3a   : > { %v2298_v50 = vpop.xlane.xlu0 %2297 }
 0xb3b   : > { %v2316_v21 = vsub.f32 %v2181_v0, %v2298_v50 }
 0xb3d   : > { %v2326_v55 = vmul.f32 1.442695, %v2316_v21 }
 0xb3e   : > { %v2301_v1 = vpop.xlane.xlu0 %2300 }
 0xb3f   : > { %3377 = vpow2.f32 %v2326_v55  ;;  %v2317_v14 = vsub.f32 %v2184_v7, %v2301_v1 }
 0xb41   : > { %v2328_v53 = vmul.f32 1.442695, %v2317_v14 }
 0xb42   : > { %v2304_v56 = vpop.xlane.xlu0 %2303 }
 0xb43   : > { %3379 = vpow2.f32 %v2328_v53  ;;  %v2318_v57 = vsub.f32 %v2232_v19, %v2304_v56 }
 0xb44   : > { %3381 = vpow2.f32 %v2332_v34  ;;  %v2313_v13 = vpop.xlane.xlu1 %2312 }
 0xb45   : > { %v2330_v58 = vmul.f32 1.442695, %v2318_v57 }
 0xb46   : > { %v2310_v48 = vpop.xlane.xlu0 %2309 }
 0xb47   : > { %3383 = vpow2.f32 %v2330_v58  ;;  %v2320_v25 = vsub.f32 %v2283_v16, %v2310_v48  ;;  %v2321_v16 = vsub.f32 %v4138_v24, %v2313_v13 }
 0xb49   : > { %v4151_v39 = vpop.eup %3377  ;;  %v2334_v61 = vmul.f32 1.442695, %v2320_v25  ;;  %v2336_v18 = vmul.f32 1.442695, %v2321_v16 }
 0xb4a   : > { %v2344_v32 = vsel %vm554_vm2, %v4151_v39, 0.0 }
 0xb4b   : > { %3385 = vpow2.f32 %v2334_v61  ;;  %2345 = vadd.xlane.f32.xlu0 %v2344_v32  ;;  %v3258_v61 = vld [vmem:[%s4345_s4 + $0x8] sm:$0xff]   ;;  %v3259_v32 = vld [vmem:[%s4345_s4 + $0x10] sm:$0xff]  }
 0xb4c   : > { %3387 = vpow2.f32 %v2336_v18 }
 0xb4d   : > { %v3380_v38 = vpop.eup %3379 }
 0xb4e   : > { %v2347_v63 = vsel %vm554_vm2, %v3380_v38, 0.0  ;;  %v4156_v0 = vpop.eup %3381 }
 0xb4f   : > { %2348 = vadd.xlane.f32.xlu1 %v2347_v63  ;;  %v2353_v5 = vsel %vm554_vm2, %v4156_v0, 0.0 }
 0xb51   : > { %v4158_v19 = vpop.eup %3383 }
 0xb52   : > { %v2350_v60 = vsel %vm554_vm2, %v4158_v19, 0.0 }
 0xb53   : > { %2351 = vadd.xlane.f32.xlu0 %v2350_v60  ;;  %2354 = vadd.xlane.f32.xlu1 %v2353_v5 }
 0xb55   : > { %v4164_v7 = vpop.eup %3385 }
 0xb56   : > { %v2356_v9 = vsel %vm554_vm2, %v4164_v7, 0.0 }
 0xb57   : > { %2357 = vadd.xlane.f32.xlu0 %v2356_v9 }
 0xb64   : > { %2429 = vrot.lane.b32.xlu1 %v3768_v12, %s3515_s11 }
 0xb68   : > { %2476 = vrot.lane.b32.xlu1 %v3782_v33, %s3515_s11 }
 0xb6d   : > { %2382 = vrot.lane.b32.xlu0 %v3758_v3, %s3515_s11  ;;  %v4187_v3 = vpop.eup %3387 }
 0xb6e   : > { %v2359_v12 = vsel %vm554_vm2, %v4187_v3, 0.0 }
 0xb71   : > { %1528 = vrot.lane.b32.xlu0 %v4000_v2, %s3514_s20 }
 0xb75   : > { %1532 = vrot.lane.b32.xlu0 %v4004_v8, %s3514_s20 }
 0xb79   : > { %2053 = vrot.lane.b32.xlu0 %v4116_v47, %s3512_s18 }
 0xb7d   : > { %2057 = vrot.lane.b32.xlu0 %v4120_v29, %s3512_s18 }
 0xb81   : > { %1536 = vrot.lane.b32.xlu0 %v4008_v15, %s3514_s20 }
 0xb85   : > { %1540 = vrot.lane.b32.xlu0 %v4016_v37, %s3514_s20 }
 0xb89   : > { %2061 = vrot.lane.b32.xlu0 %v4124_v10, %s3512_s18 }
 0xb8c   : > { %2360 = vadd.xlane.f32.xlu1 %v2359_v12 }
 0xb8d   : > { %2065 = vrot.lane.b32.xlu0 %v4130_v59, %s3512_s18 }
 0xb9d   : > { %2523 = vrot.lane.b32.xlu1 %v3776_v23, %s3515_s11  ;;  %s2763_s11 = sshll.u32 %s270_s19, 4  ;;  %s4294_s11 = int_to_ptr.vmem [resolvable:$true] %s2763_s11 }
 0xb9e   : > { %s3435_s17 = scalar_lea.vmem %s4294_s11, 1024  ;;  %p3442_p8 = scmp.lt.s32.totalorder %s4294_s11, %s3440_s28 }
 0xb9f   : > { %p3436_p6 = scmp.ne.s32.totalorder %s4294_s11, %s3435_s17  ;;  %p3443_p10 = scmp.lt.s32.totalorder %s3441_s12, %s3435_s17 }
 0xba1   : > { %1530 = vrot.lane.b32.xlu1 %v4002_v6, %s3514_s20  ;;  %p3437_p12 = pnand %p3436_p6, %p4354_p11  ;;  %p3444_p0 = por %p3443_p10, %p3442_p8 }
 0xba3   : > { %p3438_p13 = pneg %p3437_p12 }
 0xba4   : > { %v2340_v23 = vpop.xlane.xlu0 %2339 }
 0xba5   : > { %1534 = vrot.lane.b32.xlu1 %v4006_v11, %s3514_s20  ;;  %p3445_p2 = pnand %p3444_p0, %p3438_p13 }
 0xba6   : > { %v2343_v33 = vpop.xlane.xlu1 %2342 }
 0xba7   : > { %3389 = vrcp.f32 %v2343_v33 }
 0xba8   : > { %3391 = vrcp.f32 %v2340_v23 }
 0xba9   : > { %2055 = vrot.lane.b32.xlu1 %v4118_v51, %s3512_s18 }
 0xbad   : > { %2059 = vrot.lane.b32.xlu1 %v4122_v54, %s3512_s18 }
 0xbb1   : > { %1538 = vrot.lane.b32.xlu1 %v4010_v17, %s3514_s20  ;;  %v3390_v15 = vpop.eup %3389 }
 0xbb2   : > { %v3392_v17 = vpop.eup %3391  ;;  %v2371_v51 = vmul.f32 %v3390_v15, %v4147_v45 }
 0xbb3   : > { %v2370_v54 = vmul.f32 %v3392_v17, %v4143_v36 }
 0xbb5   : > { %1542 = vrot.lane.b32.xlu1 %v4019_v43, %s3514_s20  ;;  %s2906_s20 = sshll.u32 %s3575_s25, 10  ;;  %s2749_s25 = scalar_lea.sflag [#allocation5], %s3658_s29 }
 0xbb6   : > { %s4292_s15 = scalar_lea.hbm %s4347_s6, %s2906_s20 }
 0xbb9   : > { %2063 = vrot.lane.b32.xlu1 %v4126_v4, %s3512_s18 }
 0xbbd   : > { %2067 = vrot.lane.b32.xlu1 %v4133_v62, %s3512_s18  ;;  %v2378_v62 = vpack.c.bf16 %v2371_v51, %v2370_v54 }
 0xbd8   : > { %v2346_v2 = vpop.xlane.xlu0 %2345 }
 0xbd9   : > { %3393 = vrcp.f32 %v2346_v2 }
 0xbdc   : > { %v2349_v6 = vpop.xlane.xlu1 %2348 }
 0xbdd   : > { %3395 = vrcp.f32 %v2349_v6 }
 0xbe0   : > { %v2352_v8 = vpop.xlane.xlu0 %2351  ;;  %v2355_v11 = vpop.xlane.xlu1 %2354 }
 0xbe1   : > { %3397 = vrcp.f32 %v2352_v8 }
 0xbe2   : > { %3399 = vrcp.f32 %v2355_v11 }
 0xbe3   : > { %v3394_v47 = vpop.eup %3393 }
 0xbe4   : > { %v2358_v37 = vpop.xlane.xlu0 %2357  ;;  %v2430_v43 = vpop.permute.xlu1 %2429  ;;  %v2372_v10 = vmul.f32 %v3394_v47, %v4151_v39  ;;  %v3257_v39 = vld [vmem:[%s4345_s4] sm:$0xff]  }
 0xbe5   : > { %3154 = vmatpush3.bf16.msra.mxu1 %v2430_v43  ;;  %3401 = vrcp.f32 %v2358_v37 }
 0xbe6   : > { %3165 = vmatprep.subr.bf16.mxu1 %v3507_v49 }
 0xbe7   : > { %v3396_v29 = vpop.eup %3395 }
 0xbe8   : > { %v2373_v4 = vmul.f32 %v3396_v29, %v3380_v38  ;;  %v2383_v59 = vpop.permute.xlu0 %2382  ;;  %v2477_v27 = vpop.permute.xlu1 %2476  ;;  %v3260_v38 = vld [vmem:[%s4345_s4 + $0x18] sm:$0xff]  }
 0xbe9   : > { %3148 = vmatpush3.bf16.msra.mxu0 %v2383_v59 }
 0xbea   : > { %3159 = vmatprep.subr.bf16.mxu0 %v3507_v49  ;;  %v2379_v22 = vpack.c.bf16 %v2373_v4, %v2372_v10 }
 0xbeb   : > { %v3398_v24 = vpop.eup %3397 }
 0xbec   : > { %v3400_v26 = vpop.eup %3399  ;;  %v1529_v30 = vpop.permute.xlu0 %1528  ;;  %3150 = vmatmul.mubr.msk.bf16.vlgmr.msra.gmra.mrb[60].mxu0 %vm554_vm2, %v2378_v62  ;;  %3156 = vmatmul.mubr.msk.bf16.vlgmr.msra.gmra.mrb[68].mxu1 %vm554_vm2, %v2379_v22  ;;  %v2374_v31 = vmul.f32 %v3398_v24, %v4158_v19 }
 0xbed   : > { %1553 = vst.msk [vmem:[#allocation2] sm:$0xff] %vm1552_vm3, %v1529_v30  ;;  %3160 = vmatpush3.bf16.msra.mxu0 %v2477_v27  ;;  %3161 = vmatprep.mubr.msk.bf16.mxu0 %vm3508_vm1, %v3507_v49  ;;  %v2375_v35 = vmul.f32 %v3400_v26, %v4156_v0 }
 0xbee   : > { %3167 = vmatprep.mubr.msk.bf16.mxu1 %vm3508_vm1, %v3507_v49  ;;  %3171 = vmatprep.subr.bf16.mxu0 %v3257_v39 }
 0xbef   : > { %v2380_v41 = vpack.c.bf16 %v2375_v35, %v2374_v31  ;;  %v3402_v21 = vpop.eup %3401  ;;  %v2888_v35 = vld [vmem:[%s4346_s5] ss:$0 sm:$0xff] }
 0xbf0   : > { %v1533_v40 = vpop.permute.xlu0 %1532  ;;  %v2376_v55 = vmul.f32 %v3402_v21, %v4164_v7 }
 0xbf1   : > { %1555 = vst.msk [vmem:[#allocation2 + $0x10] sm:$0xff] %vm1552_vm3, %v1533_v40 }
 0xbf4   : > { %v2054_v42 = vpop.permute.xlu0 %2053  ;;  %3162 = vmatmul.mubr.msk.bf16.vlgmr.msra.gmra.mrb[64].mxu0 %vm554_vm2, %v2380_v41 }
 0xbf5   : > { %2078 = vst.msk [vmem:[#allocation2] sm:$0xff] %vm2077_vm4, %v2054_v42  ;;  %3172 = vmatpush3.bf16.msra.mxu0 %v3257_v39 }
 0xbf6   : > { %3173 = vmatprep.subr.bf16.mxu0 %v3258_v61 }
 0xbf8   : > { %v2058_v28 = vpop.permute.xlu0 %2057 }
 0xbf9   : > { %2080 = vst.msk [vmem:[#allocation2 + $0x10] sm:$0xff] %vm2077_vm4, %v2058_v28  ;;  %3174 = vmatpush3.bf16.msra.mxu0 %v3258_v61 }
 0xbfa   : > { %3175 = vmatprep.subr.bf16.mxu0 %v3259_v32 }
 0xbfc   : > { %v1537_v36 = vpop.permute.xlu0 %1536 }
 0xbfd   : > { %1557 = vst.msk [vmem:[#allocation2 + $0x20] sm:$0xff] %vm1552_vm3, %v1537_v36  ;;  %3176 = vmatpush3.bf16.msra.mxu0 %v3259_v32 }
 0xbfe   : > { %3177 = vmatprep.subr.bf16.mxu0 %v3260_v38 }
 0xc00   : > { %v1541_v44 = vpop.permute.xlu0 %1540 }
 0xc01   : > { %1559 = vst.msk [vmem:[#allocation2 + $0x30] sm:$0xff] %vm1552_vm3, %v1541_v44  ;;  %3178 = vmatpush3.bf16.msra.mxu0 %v3260_v38 }
 0xc04   : > { %v2062_v49 = vpop.permute.xlu0 %2061 }
 0xc05   : > { %2082 = vst.msk [vmem:[#allocation2 + $0x20] sm:$0xff] %vm2077_vm4, %v2062_v49 }
 0xc08   : > { %v2066_v45 = vpop.permute.xlu0 %2065 }
 0xc09   : > { %2084 = vst.msk [vmem:[#allocation2 + $0x30] sm:$0xff] %vm2077_vm4, %v2066_v45 }
 0xc19   : > { %v2361_v46 = vpop.xlane.xlu1 %2360 }
 0xc1a   : > { %3403 = vrcp.f32 %v2361_v46 }
 0xc1d   : > { %v2524_v20 = vpop.permute.xlu1 %2523 }
 0xc1e   : > { %3166 = vmatpush3.bf16.msra.mxu1 %v2524_v20 }
 0xc21   : > { %v1531_v50 = vpop.permute.xlu1 %1530 }
 0xc22   : > { %1554 = vst.msk [vmem:[#allocation2 + $0x8] sm:$0xff] %vm1552_vm3, %v1531_v50 }
 0xc24   : > { %v3404_v52 = vpop.eup %3403 }
 0xc25   : > { %v2377_v1 = vmul.f32 %v3404_v52, %v4187_v3  ;;  %v1535_v14 = vpop.permute.xlu1 %1534 }
 0xc26   : > { %1556 = vst.msk [vmem:[#allocation2 + $0x18] sm:$0xff] %vm1552_vm3, %v1535_v14 }
 0xc27   : > { %v2381_v34 = vpack.c.bf16 %v2377_v1, %v2376_v55 }
 0xc29   : > { %3168 = vmatmul.mubr.msk.bf16.vlgmr.msra.gmra.mrb[72].mxu1 %vm554_vm2, %v2381_v34  ;;  %v2056_v53 = vpop.permute.xlu1 %2055 }
 0xc2a   : > { %2079 = vst.msk [vmem:[#allocation2 + $0x8] sm:$0xff] %vm2077_vm4, %v2056_v53 }
 0xc2d   : > { %v2060_v56 = vpop.permute.xlu1 %2059 }
 0xc2e   : > { %2081 = vst.msk [vmem:[#allocation2 + $0x18] sm:$0xff] %vm2077_vm4, %v2060_v56 }
 0xc31   : > { %v1539_v57 = vpop.permute.xlu1 %1538 }
 0xc32   : > { %1558 = vst.msk [vmem:[#allocation2 + $0x28] sm:$0xff] %vm1552_vm3, %v1539_v57 }
 0xc35   : > { %v1543_v58 = vpop.permute.xlu1 %1542 }
 0xc36   : > { %1560 = vst.msk [vmem:[#allocation2 + $0x38] sm:$0xff] %vm1552_vm3, %v1543_v58 }
 0xc39   : > { %v2064_v48 = vpop.permute.xlu1 %2063 }
 0xc3a   : > { %2083 = vst.msk [vmem:[#allocation2 + $0x28] sm:$0xff] %vm2077_vm4, %v2064_v48 }
 0xc3d   : > { %v2068_v25 = vpop.permute.xlu1 %2067 }
 0xc3e   : > { %2085 = vst.msk [vmem:[#allocation2 + $0x38] sm:$0xff] %vm2077_vm4, %v2068_v25 }
 0xcbf   : > { %v2422_v63 = vpop.f32.mrb[60].mxu0  ;;  %v2469_v0 = vpop.f32.mrb[68].mxu1 }
 0xcc0   : > { %2578 = vrot.lane.b32.xlu0 %v2422_v63, %s3510_s8  ;;  %v3151_v19 = vpop.f32.mrb[61].mxu0  ;;  %v3157_v60 = vpop.f32.mrb[69].mxu1 }
 0xcc1   : > { %v2425_v5 = vpop.f32.mrb[62].mxu0  ;;  %v2472_v7 = vpop.f32.mrb[70].mxu1 }
 0xcc2   : > { %2580 = vrot.lane.b32.xlu1 %v2425_v5, %s3510_s8  ;;  %v3152_v9 = vpop.f32.mrb[63].mxu0  ;;  %v3158_v13 = vpop.f32.mrb[71].mxu1 }
 0xcc4   : > { %2582 = vrot.lane.b32.xlu0 %v2469_v0, %s3510_s8 }
 0xcc6   : > { %2584 = vrot.lane.b32.xlu1 %v2472_v7, %s3510_s8 }
 0xcc7   : > { %v2516_v16 = vpop.f32.mrb[64].mxu0 }
 0xcc8   : > { %v3163_v18 = vpop.f32.mrb[65].mxu0  ;;  %2586 = vrot.lane.b32.xlu0 %v2516_v16, %s3510_s8 }
 0xcc9   : > { %v2519_v3 = vpop.f32.mrb[66].mxu0 }
 0xcca   : > { %v3164_v12 = vpop.f32.mrb[67].mxu0  ;;  %2588 = vrot.lane.b32.xlu1 %v2519_v3, %s3510_s8 }
 0xcfc   : > { %v2563_v23 = vpop.f32.mrb[72].mxu1 }
 0xcfd   : > { %2590 = vrot.lane.b32.xlu0 %v2563_v23, %s3510_s8  ;;  %v3169_v33 = vpop.f32.mrb[73].mxu1 }
 0xcfe   : > { %v2566_v2 = vpop.f32.mrb[74].mxu1 }
 0xcff   : > { %2592 = vrot.lane.b32.xlu1 %v2566_v2, %s3510_s8  ;;  %v3170_v6 = vpop.f32.mrb[75].mxu1 }
 0xd32   : > { %v2579_v8 = vpop.permute.xlu0 %2578 }
 0xd33   : > { %2603 = vst.msk [vmem:[#allocation2] sm:$0xff] %vm2602_vm5, %v2579_v8 }
 0xd34   : > { %v2581_v11 = vpop.permute.xlu1 %2580 }
 0xd35   : > { %2604 = vst.msk [vmem:[#allocation2 + $0x8] sm:$0xff] %vm2602_vm5, %v2581_v11 }
 0xd36   : > { %v2583_v15 = vpop.permute.xlu0 %2582 }
 0xd37   : > { %2605 = vst.msk [vmem:[#allocation2 + $0x10] sm:$0xff] %vm2602_vm5, %v2583_v15 }
 0xd38   : > { %v2585_v17 = vpop.permute.xlu1 %2584 }
 0xd39   : > { %2606 = vst.msk [vmem:[#allocation2 + $0x18] sm:$0xff] %vm2602_vm5, %v2585_v17 }
 0xd3a   : > { %v2587_v37 = vpop.permute.xlu0 %2586  ;;  %v2611_v47 = vld [vmem:[#allocation2] sm:$0xff] }
 0xd3b   : > { %2607 = vst.msk [vmem:[#allocation2 + $0x20] sm:$0xff] %vm2602_vm5, %v2587_v37 }
 0xd3c   : > { %v2589_v43 = vpop.permute.xlu1 %2588  ;;  %v2612_v51 = vld [vmem:[#allocation2 + $0x8] sm:$0xff] }
 0xd3d   : > { %2608 = vst.msk [vmem:[#allocation2 + $0x28] sm:$0xff] %vm2602_vm5, %v2589_v43  ;;  %v2619_v29 = vpack.c.bf16 %v2612_v51, %v2611_v47 }
 0xd3e   : > { %v2613_v54 = vld [vmem:[#allocation2 + $0x10] sm:$0xff] }
 0xd3f   : > { %3179 = vmatprep.mubr.msk.bf16.mxu0 %vm2662_vm6, %v2619_v29 }
 0xd40   : > { %v2614_v10 = vld [vmem:[#allocation2 + $0x18] sm:$0xff] }
 0xd41   : > { %v2620_v4 = vpack.c.bf16 %v2614_v10, %v2613_v54 }
 0xd42   : > { %v2615_v59 = vld [vmem:[#allocation2 + $0x20] sm:$0xff] }
 0xd43   : > { %3180 = vmatmul.mubr.msk.bf16.vlgmr.msra.gmra.mrb[68].mxu0 %vm2662_vm6, %v2620_v4 }
 0xd44   : > { %v2616_v62 = vld [vmem:[#allocation2 + $0x28] sm:$0xff] }
 0xd45   : > { %v2621_v22 = vpack.c.bf16 %v2616_v62, %v2615_v59 }
 0xd47   : > { %3183 = vmatprep.mubr.msk.bf16.mxu0 %vm2662_vm6, %v2621_v22 }
 0xd6f   : > { %v2591_v24 = vpop.permute.xlu0 %2590 }
 0xd70   : > { %2609 = vst.msk [vmem:[#allocation2 + $0x30] sm:$0xff] %vm2602_vm5, %v2591_v24 }
 0xd71   : > { %v2593_v26 = vpop.permute.xlu1 %2592 }
 0xd72   : > { %2610 = vst.msk [vmem:[#allocation2 + $0x38] sm:$0xff] %vm2602_vm5, %v2593_v26 }
 0xd77   : > { %v2617_v27 = vld [vmem:[#allocation2 + $0x30] sm:$0xff] }
 0xd79   : > { %v2618_v30 = vld [vmem:[#allocation2 + $0x38] sm:$0xff] }
 0xd7a   : > { %v2622_v31 = vpack.c.bf16 %v2618_v30, %v2617_v27 }
 0xd7c   : > { %3184 = vmatmul.mubr.msk.bf16.gmra.mrb[72].mxu0 %vm2662_vm6, %v2622_v31 }
 0xe16   : > { %v3181_v40 = vpop.f32.mrb[68].mxu0 }
 0xe17   : > { %v2718_v41 = vadd.f32 %v3181_v40, %v2888_v35  ;;  %v2709_v42 = vpop.f32.mrb[69].mxu0 }
 0xe18   : > { %v2710_v28 = vadd.f32 %v2888_v35, %v2709_v42  ;;  %v3182_v36 = vpop.f32.mrb[70].mxu0 }
 0xe19   : > { %2742 = vst.msk [vmem:[%s270_s19 + $0x10] sm:$0xff] %vm284_vm0, %v2718_v41  ;;  %v2721_v44 = vadd.f32 %v3182_v36, %v2888_v35  ;;  %v2712_v49 = vpop.f32.mrb[71].mxu0 }
 0xe1a   : > { %2740 = vst.msk [vmem:[%s270_s19] sm:$0xff] %vm284_vm0, %v2710_v28  ;;  %v2713_v45 = vadd.f32 %v2888_v35, %v2712_v49 }
 0xe1b   : > { %2743 = vst.msk [vmem:[%s270_s19 + $0x18] sm:$0xff] %vm284_vm0, %v2721_v44 }
 0xe1c   : > { %2741 = vst.msk [vmem:[%s270_s19 + $0x8] sm:$0xff] %vm284_vm0, %v2713_v45 }
 0xe4f   : > { %v3185_v46 = vpop.f32.mrb[72].mxu0 }
 0xe50   : > { %v2734_v20 = vadd.f32 %v3185_v46, %v2888_v35  ;;  %v2725_v50 = vpop.f32.mrb[73].mxu0 }
 0xe51   : > { %v2726_v21 = vadd.f32 %v2888_v35, %v2725_v50  ;;  %v3186_v52 = vpop.f32.mrb[74].mxu0 }
 0xe52   : > { %2746 = vst.msk [vmem:[%s270_s19 + $0x30] sm:$0xff] %vm284_vm0, %v2734_v20  ;;  %v2737_v55 = vadd.f32 %v3186_v52, %v2888_v35  ;;  %v2728_v1 = vpop.f32.mrb[75].mxu0 }
 0xe53   : > { %2744 = vst.msk [vmem:[%s270_s19 + $0x20] sm:$0xff] %vm284_vm0, %v2726_v21  ;;  %v2729_v14 = vadd.f32 %v2888_v35, %v2728_v1 }
 0xe54   : > { %2747 = vst.msk [vmem:[%s270_s19 + $0x38] sm:$0xff] %vm284_vm0, %v2737_v55 }
 0xe55   : > { %2745 = vst.msk [vmem:[%s270_s19 + $0x28] sm:$0xff] %vm284_vm0, %v2729_v14 }
 0xe56   : > { %3448 = shalt.err (!%p3445_p2)
}
 0xe57   : > { %s3449_s13 = scalar_lea.hbm %s4292_s15, 1024  ;;  %s3453_s18 = scalar_lea.hbm %s4347_s6, 2048 }
 0xe58   : > { %p3450_p4 = scmp.ne.s32.totalorder %s4292_s15, %s3449_s13  ;;  %p3454_p9 = scmp.lt.u32.totalorder %s4292_s15, %s4347_s6 }
 0xe59   : > { %p3455_p1 = scmp.lt.u32.totalorder %s3453_s18, %s3449_s13  ;;  %p3457_p6 = scmp.lt.u32.totalorder %s3449_s13, %s4292_s15 }
 0xe5a   : > { %p3451_p5 = pnand %p3450_p4, %p4354_p11 }
 0xe5b   : > { %p3456_p3 = por %p3455_p1, %p3454_p9 }
 0xe5c   : > { %p3452_p7 = pneg %p3451_p5 }
 0xe5d   : > { %p3458_p12 = por %p3457_p6, %p3456_p3 }
 0xe5f   : > { %p3459_p13 = pnand %p3458_p12, %p3452_p7 }
 0xe61   : > { %3462 = shalt.err (!%p3459_p13)
}
 0xe62   : > { %s3517_s7 = smov 128   ;;  %s3518_s14 = smov 8  }
 0xe63   : > { %3193 = dma.vmem_to_hbm [thread:$0]  (%p4354_p11), %s4294_s11, 1024, %s4292_s15, %s2749_s25, %s3517_s7, %s3517_s7, %s3518_s14  }
 0xe64 PF: > { %s2778_s17 = sand.u32 1, %s3489_s21   ;;  %p4355_p8 = scmp.ne.s32.totalorder %s4352_s10, 0 }
 0xe65   : > { %p4356_p10 = scmp.ge.s32.totalorder %s3501_s24, 2  ;;  %s2779_s26 = scalar_lea.sflag [#allocation5], %s2778_s17 }
 0xe67   : > { %p3200_p0 = pnand %p4356_p10, %p4355_p8 }
 0xe69   : > { %3484 = dma.done.wait (!%p3200_p0), %s2779_s26, 1024  }
 0xe6a   : > { %3486 = vsyncadd (!%p3200_p0), %s2779_s26, 4294966272  ;;  %p19_p2 = scmp.ge.s32.totalorder %s3579_s27, 4   ;;  %s4357_s21 = smov %s3493_s22 }
 0xe6b   : > { %s4358_s22 = smov %s3497_s23  ;;  %s4359_s23 = smov %s3591_s30 }
 0xe6c   : > { %s4360_s24 = smov %s3579_s27  ;;  %21 = sbr.rel (!%p19_p2) target bundleno = 5 (0x5), region = 89 }
 0xe73   :  { %2784 = vsyncpa [#allocation4], 1 }
 0xe74   :  { %2786 = vsyncpa [#allocation4 + $0x1], 1 }
 0xe75   :  { %2787 = vsyncpa [#allocation5], 1 }
 0xe76   :  { %2789 = vsyncpa [#allocation5 + $0x1], 1 }

</bundles_post_ra>
